<compile_context>
chip_gen: v7x
topology: tpu7x:2x2x1
jax: 0.10.0
libtpu: 0.0.40
codegen_flags: <defaults>
</compile_context>

<pallas_src>
import math

import jax
import jax.numpy as jnp
from jax.experimental import pallas as pl

# ----------------------- small GPT-2 config -----------------------
VOCAB = 128
D_MODEL = 32
N_HEAD = 2
HEAD_DIM = D_MODEL // N_HEAD
N_LAYER = 2
SEQ = 8
BATCH = 2
LN_EPS = 1e-5


# ----------------------- fused forward kernel -----------------------
def _gpt2_fused_kernel(h0_ref, mask_ref, onehot_ref,
                       ln1_g_ref, ln1_b_ref, attn_w_ref, attn_b_ref,
                       proj_w_ref, proj_b_ref, ln2_g_ref, ln2_b_ref,
                       fc_w_ref, fc_b_ref, mlp_w_ref, mlp_b_ref,
                       lnf_g_ref, lnf_b_ref, wte_t_ref,
                       loss_ref, last_logits_ref):
    f32 = jnp.float32
    h = h0_ref[...].astype(f32)                         # (B*S, D)
    mask = mask_ref[...]                                # (B, S) f32

    # Static causal mask, built once (hoisted out of the per-(b,h) loops;
    # compile-time constant pattern for fixed SEQ).
    row = jax.lax.broadcasted_iota(jnp.int32, (SEQ, SEQ), 0)
    col = jax.lax.broadcasted_iota(jnp.int32, (SEQ, SEQ), 1)
    causal = col <= row                                 # (S, S) bool

    def ln(x, g, b):
        mu = jnp.mean(x, axis=-1, keepdims=True)
        xc = x - mu
        var = jnp.mean(xc * xc, axis=-1, keepdims=True)
        return xc * jax.lax.rsqrt(var + LN_EPS) * g + b

    scale = 1.0 / math.sqrt(HEAD_DIM)

    # NOTE: at real GPT-2 scale, cast matmul operands to bf16 with
    # preferred_element_type=f32 and tile the vocab/hidden dims; at this toy
    # size everything is a single VMEM-resident block.
    for l in range(N_LAYER):
        # ---- attention sub-block ----
        g1 = ln1_g_ref[pl.ds(l, 1), :]                  # (1, D)
        b1 = ln1_b_ref[pl.ds(l, 1), :]
        x = ln(h, g1, b1)                               # (B*S, D)

        w_qkv = attn_w_ref[pl.ds(l * D_MODEL, D_MODEL), :]   # (D, 3D)
        b_qkv = attn_b_ref[pl.ds(l, 1), :]                    # (1, 3D)
        qkv = jnp.dot(x, w_qkv, preferred_element_type=f32) + b_qkv
        q = qkv[:, 0:D_MODEL]
        k = qkv[:, D_MODEL:2 * D_MODEL]
        v = qkv[:, 2 * D_MODEL:3 * D_MODEL]

        batch_rows = []
        for b in range(BATCH):
            kmask = mask[b:b + 1, :] > 0.5              # (1, S) key mask
            keep = jnp.logical_and(causal, kmask)       # (S, S)
            head_cols = []
            for hh in range(N_HEAD):
                r0, r1 = b * SEQ, (b + 1) * SEQ
                c0, c1 = hh * HEAD_DIM, (hh + 1) * HEAD_DIM
                q_bh = q[r0:r1, c0:c1] * scale          # scale folded into Q
                k_bh = k[r0:r1, c0:c1]
                v_bh = v[r0:r1, c0:c1]
                # contract last dims of q/k — no materialized K transpose
                scores = jax.lax.dot_general(
                    q_bh, k_bh, (((1,), (1,)), ((), ())),
                    preferred_element_type=f32)         # (S, S)
                scores = jnp.where(keep, scores, -1e9)
                scores = scores - jnp.max(scores, axis=-1, keepdims=True)
                p = jnp.exp(scores)
                p = p / jnp.sum(p, axis=-1, keepdims=True)
                head_cols.append(jnp.dot(p, v_bh, preferred_element_type=f32))
            batch_rows.append(jnp.concatenate(head_cols, axis=1))   # (S, D)
        attn_out = jnp.concatenate(batch_rows, axis=0)  # (B*S, D) lane-dense

        w_proj = proj_w_ref[pl.ds(l * D_MODEL, D_MODEL), :]
        b_proj = proj_b_ref[pl.ds(l, 1), :]
        h = h + jnp.dot(attn_out, w_proj, preferred_element_type=f32) + b_proj

        # ---- MLP sub-block ----
        g2 = ln2_g_ref[pl.ds(l, 1), :]
        b2 = ln2_b_ref[pl.ds(l, 1), :]
        x2 = ln(h, g2, b2)
        w_fc = fc_w_ref[pl.ds(l * D_MODEL, D_MODEL), :]       # (D, 4D)
        b_fc = fc_b_ref[pl.ds(l, 1), :]
        fc = jnp.dot(x2, w_fc, preferred_element_type=f32) + b_fc
        # GPT-2 "gelu_new" (tanh approximation)
        fc = 0.5 * fc * (1.0 + jnp.tanh(
            0.7978845608028654 * (fc + 0.044715 * fc * fc * fc)))
        w_mp = mlp_w_ref[pl.ds(l * 4 * D_MODEL, 4 * D_MODEL), :]   # (4D, D)
        b_mp = mlp_b_ref[pl.ds(l, 1), :]
        h = h + jnp.dot(fc, w_mp, preferred_element_type=f32) + b_mp

    # ---- final LN + tied LM head (logits stay in VMEM) ----
    hf = ln(h, lnf_g_ref[...], lnf_b_ref[...])                  # (B*S, D)
    logits = jnp.dot(hf, wte_t_ref[...], preferred_element_type=f32)  # (B*S, V)

    # last-token logits for sampling (raw logits; softmax not needed)
    last_rows = [logits[(b + 1) * SEQ - 1:(b + 1) * SEQ, :] for b in range(BATCH)]
    last_logits_ref[...] = jnp.concatenate(last_rows, axis=0)   # (B, V)

    # shifted LM cross-entropy, mean over valid (non-ignored) positions
    shift_rows = [logits[b * SEQ:(b + 1) * SEQ - 1, :] for b in range(BATCH)]
    shift_logits = jnp.concatenate(shift_rows, axis=0)          # (B*(S-1), V)
    m = jnp.max(shift_logits, axis=-1, keepdims=True)
    lse = jnp.log(jnp.sum(jnp.exp(shift_logits - m), axis=-1, keepdims=True)) + m
    onehot = onehot_ref[...]                                    # (N, V), lane-dense
    label_logit = jnp.sum(shift_logits * onehot, axis=-1, keepdims=True)
    valid = jnp.sum(onehot, axis=-1, keepdims=True)             # 0 for ignore_index
    nll = (lse - label_logit) * valid                           # (N, 1)
    num = jnp.sum(nll, axis=0, keepdims=True)                   # (1, 1)
    den = jnp.maximum(jnp.sum(valid, axis=0, keepdims=True), 1.0)
    loss_ref[...] = num / den


def _fused_forward(h0, attention_mask, onehot, stacked):
    return pl.pallas_call(
        _gpt2_fused_kernel,
        out_shape=(jax.ShapeDtypeStruct((1, 1), jnp.float32),
                   jax.ShapeDtypeStruct((BATCH, VOCAB), jnp.float32)),
    )(h0, attention_mask, onehot, *stacked)


# ----------------------- params -----------------------
def init_params(key):
    def nrm(k, shape):
        return 0.02 * jax.random.normal(k, shape, dtype=jnp.float32)

    keys = jax.random.split(key, 2 + 4 * N_LAYER)
    wte = nrm(keys[0], (VOCAB, D_MODEL))
    wpe = nrm(keys[1], (SEQ, D_MODEL))

    attn_w = jnp.concatenate(
        [nrm(keys[2 + 4 * l + 0], (D_MODEL, 3 * D_MODEL)) for l in range(N_LAYER)], axis=0)
    proj_w = jnp.concatenate(
        [nrm(keys[2 + 4 * l + 1], (D_MODEL, D_MODEL)) for l in range(N_LAYER)], axis=0)
    fc_w = jnp.concatenate(
        [nrm(keys[2 + 4 * l + 2], (D_MODEL, 4 * D_MODEL)) for l in range(N_LAYER)], axis=0)
    mlp_w = jnp.concatenate(
        [nrm(keys[2 + 4 * l + 3], (4 * D_MODEL, D_MODEL)) for l in range(N_LAYER)], axis=0)

    stacked = [
        jnp.ones((N_LAYER, D_MODEL), jnp.float32),       # ln1_g
        jnp.zeros((N_LAYER, D_MODEL), jnp.float32),      # ln1_b
        attn_w,                                          # (L*D, 3D)
        jnp.zeros((N_LAYER, 3 * D_MODEL), jnp.float32),  # attn_b
        proj_w,                                          # (L*D, D)
        jnp.zeros((N_LAYER, D_MODEL), jnp.float32),      # proj_b
        jnp.ones((N_LAYER, D_MODEL), jnp.float32),       # ln2_g
        jnp.zeros((N_LAYER, D_MODEL), jnp.float32),      # ln2_b
        fc_w,                                            # (L*D, 4D)
        jnp.zeros((N_LAYER, 4 * D_MODEL), jnp.float32),  # fc_b
        mlp_w,                                           # (L*4D, D)
        jnp.zeros((N_LAYER, D_MODEL), jnp.float32),      # mlp_b
        jnp.ones((1, D_MODEL), jnp.float32),             # lnf_g
        jnp.zeros((1, D_MODEL), jnp.float32),            # lnf_b
        wte.T,                                           # tied LM head, transposed once
    ]
    return {"wte": wte, "wpe": wpe, "stacked": stacked}


# ----------------------- forward (glue + one fused kernel) -----------------------
@jax.jit
def gpt2_custom_loss_forward(params, input_ids, attention_mask, labels, sample_key):
    B, S = input_ids.shape
    # embedding gather + positional add: plain-JAX glue (data-dependent gather)
    h0 = (params["wte"][input_ids] + params["wpe"][None, :, :]).reshape(B * S, D_MODEL)

    # shifted labels -> lane-dense one-hot; rows with ignore_index (-100) become
    # all-zero and are excluded from the mean (matches CrossEntropyLoss ignore_index).
    shift_labels = labels[:, 1:].reshape(-1)                              # (B*(S-1),)
    onehot = (shift_labels[:, None] ==
              jnp.arange(VOCAB, dtype=shift_labels.dtype)[None, :]).astype(jnp.float32)

    loss, last_logits = _fused_forward(
        h0, attention_mask.astype(jnp.float32), onehot, params["stacked"])
    lm_loss = loss[0, 0]

    # torch.multinomial(softmax(logits)[:, -1, :], 1): sample from raw last-token
    # logits (categorical accepts logits; numerically cleaner than log(softmax+eps)).
    predicted_token_ids = jax.random.categorical(sample_key, last_logits, axis=-1)[:, None]

    # TODO(synk): tokenizer.decode + HF distilbert sentiment pipeline have no Pallas
    # equivalent; their loss_values never feed total_loss in the reference anyway.
    # TODO(synk): self.custom_loss / self.custom_loss_alpha are undefined in the
    # reference module's __init__; treated as zero contribution here.
    custom_loss_alpha = 0.0
    custom_loss = 0.0
    total_loss = lm_loss + custom_loss_alpha * custom_loss
    return total_loss, predicted_token_ids


if __name__ == "__main__":
    root = jax.random.PRNGKey(0)
    k_param, k_ids, k_sample = jax.random.split(root, 3)

    params = init_params(k_param)
    input_ids = jax.random.randint(k_ids, (BATCH, SEQ), 0, VOCAB, dtype=jnp.int32)
    attention_mask = jnp.ones((BATCH, SEQ), dtype=jnp.float32)
    labels = input_ids  # standard LM setup: labels == input_ids (shift done internally)

    total_loss, sampled = gpt2_custom_loss_forward(
        params, input_ids, attention_mask, labels, k_sample)
    total_loss = jax.block_until_ready(total_loss)
    jax.block_until_ready(sampled)
    assert jnp.isfinite(total_loss)
    print("KERNEL_OK")
</pallas_src>

<mosaic_0001>
module attributes {stable_mosaic.version = 11 : i64} {
  func.func @_gpt2_fused_kernel(%arg0: memref<16x32xf32, #tpu.memory_space<vmem>>, %arg1: memref<2x8xf32, #tpu.memory_space<vmem>>, %arg2: memref<14x128xf32, #tpu.memory_space<vmem>>, %arg3: memref<2x32xf32, #tpu.memory_space<vmem>>, %arg4: memref<2x32xf32, #tpu.memory_space<vmem>>, %arg5: memref<64x96xf32, #tpu.memory_space<vmem>>, %arg6: memref<2x96xf32, #tpu.memory_space<vmem>>, %arg7: memref<64x32xf32, #tpu.memory_space<vmem>>, %arg8: memref<2x32xf32, #tpu.memory_space<vmem>>, %arg9: memref<2x32xf32, #tpu.memory_space<vmem>>, %arg10: memref<2x32xf32, #tpu.memory_space<vmem>>, %arg11: memref<64x128xf32, #tpu.memory_space<vmem>>, %arg12: memref<2x128xf32, #tpu.memory_space<vmem>>, %arg13: memref<256x32xf32, #tpu.memory_space<vmem>>, %arg14: memref<2x32xf32, #tpu.memory_space<vmem>>, %arg15: memref<1x32xf32, #tpu.memory_space<vmem>>, %arg16: memref<1x32xf32, #tpu.memory_space<vmem>>, %arg17: memref<32x128xf32, #tpu.memory_space<vmem>>, %arg18: memref<1x1xf32, #tpu.memory_space<vmem>>, %arg19: memref<2x128xf32, #tpu.memory_space<vmem>>) attributes {dimension_semantics = [], scalar_prefetch = 0 : i64, scratch_operands = 0 : i64, tpu.core_type = #tpu.core_type<tc>} {
    %c0 = arith.constant 0 : index
    %c0_0 = arith.constant 0 : index
    %0 = vector.load %arg0[%c0, %c0_0] : memref<16x32xf32, #tpu.memory_space<vmem>>, vector<16x32xf32>
    %c0_1 = arith.constant 0 : index
    %c0_2 = arith.constant 0 : index
    %1 = vector.load %arg1[%c0_1, %c0_2] : memref<2x8xf32, #tpu.memory_space<vmem>>, vector<2x8xf32>
    %2 = tpu.iota {dimensions = array<i32: 0>} : vector<8x8xi32>
    %3 = tpu.iota {dimensions = array<i32: 1>} : vector<8x8xi32>
    %4 = arith.cmpi sle, %3, %2 : vector<8x8xi32>
    %c0_3 = arith.constant 0 : index
    %c0_4 = arith.constant 0 : index
    %5 = vector.load %arg3[%c0_3, %c0_4] : memref<2x32xf32, #tpu.memory_space<vmem>>, vector<1x32xf32>
    %c0_5 = arith.constant 0 : index
    %c0_6 = arith.constant 0 : index
    %6 = vector.load %arg4[%c0_5, %c0_6] : memref<2x32xf32, #tpu.memory_space<vmem>>, vector<1x32xf32>
    %cst = arith.constant dense<0.000000e+00> : vector<16xf32>
    %7 = vector.multi_reduction <add>, %0, %cst [1] : vector<16x32xf32> to vector<16xf32>
    %8 = vector.shape_cast %7 : vector<16xf32> to vector<16x1xf32>
    %cst_7 = arith.constant 3.200000e+01 : f32
    %9 = vector.broadcast %cst_7 : f32 to vector<16x1xf32>
    %10 = arith.divf %8, %9 : vector<16x1xf32>
    %11 = vector.broadcast %10 : vector<16x1xf32> to vector<16x32xf32>
    %12 = arith.subf %0, %11 : vector<16x32xf32>
    %13 = arith.mulf %12, %12 : vector<16x32xf32>
    %cst_8 = arith.constant dense<0.000000e+00> : vector<16xf32>
    %14 = vector.multi_reduction <add>, %13, %cst_8 [1] : vector<16x32xf32> to vector<16xf32>
    %15 = vector.shape_cast %14 : vector<16xf32> to vector<16x1xf32>
    %cst_9 = arith.constant 3.200000e+01 : f32
    %16 = vector.broadcast %cst_9 : f32 to vector<16x1xf32>
    %17 = arith.divf %15, %16 : vector<16x1xf32>
    %cst_10 = arith.constant 9.99999974E-6 : f32
    %18 = vector.broadcast %cst_10 : f32 to vector<16x1xf32>
    %19 = arith.addf %17, %18 : vector<16x1xf32>
    %20 = math.rsqrt %19 : vector<16x1xf32>
    %21 = vector.broadcast %20 : vector<16x1xf32> to vector<16x32xf32>
    %22 = arith.mulf %12, %21 : vector<16x32xf32>
    %23 = vector.broadcast %5 : vector<1x32xf32> to vector<16x32xf32>
    %24 = arith.mulf %22, %23 : vector<16x32xf32>
    %25 = vector.broadcast %6 : vector<1x32xf32> to vector<16x32xf32>
    %26 = arith.addf %24, %25 : vector<16x32xf32>
    %c0_11 = arith.constant 0 : index
    %c0_12 = arith.constant 0 : index
    %27 = vector.load %arg5[%c0_11, %c0_12] : memref<64x96xf32, #tpu.memory_space<vmem>>, vector<32x96xf32>
    %c0_13 = arith.constant 0 : index
    %c0_14 = arith.constant 0 : index
    %28 = vector.load %arg6[%c0_13, %c0_14] : memref<2x96xf32, #tpu.memory_space<vmem>>, vector<1x96xf32>
    %cst_15 = arith.constant dense<0.000000e+00> : vector<16x96xf32>
    %29 = tpu.matmul %26, %27, %cst_15 {dimension_numbers = #tpu.dot_dimension_numbers<[1], [0], [0], [1], [0, 0, 1, 1], [], []>} : vector<16x32xf32>, vector<32x96xf32>, vector<16x96xf32> -> vector<16x96xf32>
    %30 = vector.broadcast %28 : vector<1x96xf32> to vector<16x96xf32>
    %31 = arith.addf %29, %30 : vector<16x96xf32>
    %32 = vector.extract_strided_slice %31 {offsets = [0, 0], sizes = [16, 32], strides = [1, 1]} : vector<16x96xf32> to vector<16x32xf32>
    %33 = vector.extract_strided_slice %31 {offsets = [0, 32], sizes = [16, 32], strides = [1, 1]} : vector<16x96xf32> to vector<16x32xf32>
    %34 = vector.extract_strided_slice %31 {offsets = [0, 64], sizes = [16, 32], strides = [1, 1]} : vector<16x96xf32> to vector<16x32xf32>
    %35 = vector.extract_strided_slice %1 {offsets = [0, 0], sizes = [1, 8], strides = [1, 1]} : vector<2x8xf32> to vector<1x8xf32>
    %cst_16 = arith.constant 5.000000e-01 : f32
    %36 = vector.broadcast %cst_16 : f32 to vector<1x8xf32>
    %37 = arith.cmpf ogt, %35, %36 : vector<1x8xf32>
    %38 = vector.broadcast %37 : vector<1x8xi1> to vector<8x8xi1>
    %39 = arith.andi %4, %38 : vector<8x8xi1>
    %40 = vector.extract_strided_slice %32 {offsets = [0, 0], sizes = [8, 16], strides = [1, 1]} : vector<16x32xf32> to vector<8x16xf32>
    %cst_17 = arith.constant 2.500000e-01 : f32
    %41 = vector.broadcast %cst_17 : f32 to vector<8x16xf32>
    %42 = arith.mulf %40, %41 : vector<8x16xf32>
    %43 = vector.extract_strided_slice %33 {offsets = [0, 0], sizes = [8, 16], strides = [1, 1]} : vector<16x32xf32> to vector<8x16xf32>
    %44 = vector.extract_strided_slice %34 {offsets = [0, 0], sizes = [8, 16], strides = [1, 1]} : vector<16x32xf32> to vector<8x16xf32>
    %cst_18 = arith.constant dense<0.000000e+00> : vector<8x8xf32>
    %45 = tpu.matmul %42, %43, %cst_18 {dimension_numbers = #tpu.dot_dimension_numbers<[1], [1], [0], [0], [0, 0, 1, 0], [], []>} : vector<8x16xf32>, vector<8x16xf32>, vector<8x8xf32> -> vector<8x8xf32>
    %cst_19 = arith.constant -1.000000e+09 : f32
    %46 = vector.broadcast %cst_19 : f32 to vector<8x8xf32>
    %47 = arith.select %39, %45, %46 : vector<8x8xi1>, vector<8x8xf32>
    %cst_20 = arith.constant dense<0xFF800000> : vector<8xf32>
    %48 = vector.multi_reduction <maximumf>, %47, %cst_20 [1] : vector<8x8xf32> to vector<8xf32>
    %49 = vector.shape_cast %48 : vector<8xf32> to vector<8x1xf32>
    %50 = vector.broadcast %49 : vector<8x1xf32> to vector<8x8xf32>
    %51 = arith.subf %47, %50 : vector<8x8xf32>
    %52 = math.exp %51 : vector<8x8xf32>
    %cst_21 = arith.constant dense<0.000000e+00> : vector<8xf32>
    %53 = vector.multi_reduction <add>, %52, %cst_21 [1] : vector<8x8xf32> to vector<8xf32>
    %54 = vector.shape_cast %53 : vector<8xf32> to vector<8x1xf32>
    %55 = vector.broadcast %54 : vector<8x1xf32> to vector<8x8xf32>
    %56 = arith.divf %52, %55 : vector<8x8xf32>
    %cst_22 = arith.constant dense<0.000000e+00> : vector<8x16xf32>
    %57 = tpu.matmul %56, %44, %cst_22 {dimension_numbers = #tpu.dot_dimension_numbers<[1], [0], [0], [1], [0, 0, 1, 1], [], []>} : vector<8x8xf32>, vector<8x16xf32>, vector<8x16xf32> -> vector<8x16xf32>
    %58 = vector.extract_strided_slice %32 {offsets = [0, 16], sizes = [8, 16], strides = [1, 1]} : vector<16x32xf32> to vector<8x16xf32>
    %cst_23 = arith.constant 2.500000e-01 : f32
    %59 = vector.broadcast %cst_23 : f32 to vector<8x16xf32>
    %60 = arith.mulf %58, %59 : vector<8x16xf32>
    %61 = vector.extract_strided_slice %33 {offsets = [0, 16], sizes = [8, 16], strides = [1, 1]} : vector<16x32xf32> to vector<8x16xf32>
    %62 = vector.extract_strided_slice %34 {offsets = [0, 16], sizes = [8, 16], strides = [1, 1]} : vector<16x32xf32> to vector<8x16xf32>
    %cst_24 = arith.constant dense<0.000000e+00> : vector<8x8xf32>
    %63 = tpu.matmul %60, %61, %cst_24 {dimension_numbers = #tpu.dot_dimension_numbers<[1], [1], [0], [0], [0, 0, 1, 0], [], []>} : vector<8x16xf32>, vector<8x16xf32>, vector<8x8xf32> -> vector<8x8xf32>
    %cst_25 = arith.constant -1.000000e+09 : f32
    %64 = vector.broadcast %cst_25 : f32 to vector<8x8xf32>
    %65 = arith.select %39, %63, %64 : vector<8x8xi1>, vector<8x8xf32>
    %cst_26 = arith.constant dense<0xFF800000> : vector<8xf32>
    %66 = vector.multi_reduction <maximumf>, %65, %cst_26 [1] : vector<8x8xf32> to vector<8xf32>
    %67 = vector.shape_cast %66 : vector<8xf32> to vector<8x1xf32>
    %68 = vector.broadcast %67 : vector<8x1xf32> to vector<8x8xf32>
    %69 = arith.subf %65, %68 : vector<8x8xf32>
    %70 = math.exp %69 : vector<8x8xf32>
    %cst_27 = arith.constant dense<0.000000e+00> : vector<8xf32>
    %71 = vector.multi_reduction <add>, %70, %cst_27 [1] : vector<8x8xf32> to vector<8xf32>
    %72 = vector.shape_cast %71 : vector<8xf32> to vector<8x1xf32>
    %73 = vector.broadcast %72 : vector<8x1xf32> to vector<8x8xf32>
    %74 = arith.divf %70, %73 : vector<8x8xf32>
    %cst_28 = arith.constant dense<0.000000e+00> : vector<8x16xf32>
    %75 = tpu.matmul %74, %62, %cst_28 {dimension_numbers = #tpu.dot_dimension_numbers<[1], [0], [0], [1], [0, 0, 1, 1], [], []>} : vector<8x8xf32>, vector<8x16xf32>, vector<8x16xf32> -> vector<8x16xf32>
    %76 = tpu.concatenate %57, %75 in 1 : vector<8x16xf32>, vector<8x16xf32> -> vector<8x32xf32>
    %77 = vector.extract_strided_slice %1 {offsets = [1, 0], sizes = [1, 8], strides = [1, 1]} : vector<2x8xf32> to vector<1x8xf32>
    %cst_29 = arith.constant 5.000000e-01 : f32
    %78 = vector.broadcast %cst_29 : f32 to vector<1x8xf32>
    %79 = arith.cmpf ogt, %77, %78 : vector<1x8xf32>
    %80 = vector.broadcast %79 : vector<1x8xi1> to vector<8x8xi1>
    %81 = arith.andi %4, %80 : vector<8x8xi1>
    %82 = vector.extract_strided_slice %32 {offsets = [8, 0], sizes = [8, 16], strides = [1, 1]} : vector<16x32xf32> to vector<8x16xf32>
    %cst_30 = arith.constant 2.500000e-01 : f32
    %83 = vector.broadcast %cst_30 : f32 to vector<8x16xf32>
    %84 = arith.mulf %82, %83 : vector<8x16xf32>
    %85 = vector.extract_strided_slice %33 {offsets = [8, 0], sizes = [8, 16], strides = [1, 1]} : vector<16x32xf32> to vector<8x16xf32>
    %86 = vector.extract_strided_slice %34 {offsets = [8, 0], sizes = [8, 16], strides = [1, 1]} : vector<16x32xf32> to vector<8x16xf32>
    %cst_31 = arith.constant dense<0.000000e+00> : vector<8x8xf32>
    %87 = tpu.matmul %84, %85, %cst_31 {dimension_numbers = #tpu.dot_dimension_numbers<[1], [1], [0], [0], [0, 0, 1, 0], [], []>} : vector<8x16xf32>, vector<8x16xf32>, vector<8x8xf32> -> vector<8x8xf32>
    %cst_32 = arith.constant -1.000000e+09 : f32
    %88 = vector.broadcast %cst_32 : f32 to vector<8x8xf32>
    %89 = arith.select %81, %87, %88 : vector<8x8xi1>, vector<8x8xf32>
    %cst_33 = arith.constant dense<0xFF800000> : vector<8xf32>
    %90 = vector.multi_reduction <maximumf>, %89, %cst_33 [1] : vector<8x8xf32> to vector<8xf32>
    %91 = vector.shape_cast %90 : vector<8xf32> to vector<8x1xf32>
    %92 = vector.broadcast %91 : vector<8x1xf32> to vector<8x8xf32>
    %93 = arith.subf %89, %92 : vector<8x8xf32>
    %94 = math.exp %93 : vector<8x8xf32>
    %cst_34 = arith.constant dense<0.000000e+00> : vector<8xf32>
    %95 = vector.multi_reduction <add>, %94, %cst_34 [1] : vector<8x8xf32> to vector<8xf32>
    %96 = vector.shape_cast %95 : vector<8xf32> to vector<8x1xf32>
    %97 = vector.broadcast %96 : vector<8x1xf32> to vector<8x8xf32>
    %98 = arith.divf %94, %97 : vector<8x8xf32>
    %cst_35 = arith.constant dense<0.000000e+00> : vector<8x16xf32>
    %99 = tpu.matmul %98, %86, %cst_35 {dimension_numbers = #tpu.dot_dimension_numbers<[1], [0], [0], [1], [0, 0, 1, 1], [], []>} : vector<8x8xf32>, vector<8x16xf32>, vector<8x16xf32> -> vector<8x16xf32>
    %100 = vector.extract_strided_slice %32 {offsets = [8, 16], sizes = [8, 16], strides = [1, 1]} : vector<16x32xf32> to vector<8x16xf32>
    %cst_36 = arith.constant 2.500000e-01 : f32
    %101 = vector.broadcast %cst_36 : f32 to vector<8x16xf32>
    %102 = arith.mulf %100, %101 : vector<8x16xf32>
    %103 = vector.extract_strided_slice %33 {offsets = [8, 16], sizes = [8, 16], strides = [1, 1]} : vector<16x32xf32> to vector<8x16xf32>
    %104 = vector.extract_strided_slice %34 {offsets = [8, 16], sizes = [8, 16], strides = [1, 1]} : vector<16x32xf32> to vector<8x16xf32>
    %cst_37 = arith.constant dense<0.000000e+00> : vector<8x8xf32>
    %105 = tpu.matmul %102, %103, %cst_37 {dimension_numbers = #tpu.dot_dimension_numbers<[1], [1], [0], [0], [0, 0, 1, 0], [], []>} : vector<8x16xf32>, vector<8x16xf32>, vector<8x8xf32> -> vector<8x8xf32>
    %cst_38 = arith.constant -1.000000e+09 : f32
    %106 = vector.broadcast %cst_38 : f32 to vector<8x8xf32>
    %107 = arith.select %81, %105, %106 : vector<8x8xi1>, vector<8x8xf32>
    %cst_39 = arith.constant dense<0xFF800000> : vector<8xf32>
    %108 = vector.multi_reduction <maximumf>, %107, %cst_39 [1] : vector<8x8xf32> to vector<8xf32>
    %109 = vector.shape_cast %108 : vector<8xf32> to vector<8x1xf32>
    %110 = vector.broadcast %109 : vector<8x1xf32> to vector<8x8xf32>
    %111 = arith.subf %107, %110 : vector<8x8xf32>
    %112 = math.exp %111 : vector<8x8xf32>
    %cst_40 = arith.constant dense<0.000000e+00> : vector<8xf32>
    %113 = vector.multi_reduction <add>, %112, %cst_40 [1] : vector<8x8xf32> to vector<8xf32>
    %114 = vector.shape_cast %113 : vector<8xf32> to vector<8x1xf32>
    %115 = vector.broadcast %114 : vector<8x1xf32> to vector<8x8xf32>
    %116 = arith.divf %112, %115 : vector<8x8xf32>
    %cst_41 = arith.constant dense<0.000000e+00> : vector<8x16xf32>
    %117 = tpu.matmul %116, %104, %cst_41 {dimension_numbers = #tpu.dot_dimension_numbers<[1], [0], [0], [1], [0, 0, 1, 1], [], []>} : vector<8x8xf32>, vector<8x16xf32>, vector<8x16xf32> -> vector<8x16xf32>
    %118 = tpu.concatenate %99, %117 in 1 : vector<8x16xf32>, vector<8x16xf32> -> vector<8x32xf32>
    %119 = tpu.concatenate %76, %118 in 0 : vector<8x32xf32>, vector<8x32xf32> -> vector<16x32xf32>
    %c0_42 = arith.constant 0 : index
    %c0_43 = arith.constant 0 : index
    %120 = vector.load %arg7[%c0_42, %c0_43] : memref<64x32xf32, #tpu.memory_space<vmem>>, vector<32x32xf32>
    %c0_44 = arith.constant 0 : index
    %c0_45 = arith.constant 0 : index
    %121 = vector.load %arg8[%c0_44, %c0_45] : memref<2x32xf32, #tpu.memory_space<vmem>>, vector<1x32xf32>
    %cst_46 = arith.constant dense<0.000000e+00> : vector<16x32xf32>
    %122 = tpu.matmul %119, %120, %cst_46 {dimension_numbers = #tpu.dot_dimension_numbers<[1], [0], [0], [1], [0, 0, 1, 1], [], []>} : vector<16x32xf32>, vector<32x32xf32>, vector<16x32xf32> -> vector<16x32xf32>
    %123 = arith.addf %0, %122 : vector<16x32xf32>
    %124 = vector.broadcast %121 : vector<1x32xf32> to vector<16x32xf32>
    %125 = arith.addf %123, %124 : vector<16x32xf32>
    %c0_47 = arith.constant 0 : index
    %c0_48 = arith.constant 0 : index
    %126 = vector.load %arg9[%c0_47, %c0_48] : memref<2x32xf32, #tpu.memory_space<vmem>>, vector<1x32xf32>
    %c0_49 = arith.constant 0 : index
    %c0_50 = arith.constant 0 : index
    %127 = vector.load %arg10[%c0_49, %c0_50] : memref<2x32xf32, #tpu.memory_space<vmem>>, vector<1x32xf32>
    %cst_51 = arith.constant dense<0.000000e+00> : vector<16xf32>
    %128 = vector.multi_reduction <add>, %125, %cst_51 [1] : vector<16x32xf32> to vector<16xf32>
    %129 = vector.shape_cast %128 : vector<16xf32> to vector<16x1xf32>
    %cst_52 = arith.constant 3.200000e+01 : f32
    %130 = vector.broadcast %cst_52 : f32 to vector<16x1xf32>
    %131 = arith.divf %129, %130 : vector<16x1xf32>
    %132 = vector.broadcast %131 : vector<16x1xf32> to vector<16x32xf32>
    %133 = arith.subf %125, %132 : vector<16x32xf32>
    %134 = arith.mulf %133, %133 : vector<16x32xf32>
    %cst_53 = arith.constant dense<0.000000e+00> : vector<16xf32>
    %135 = vector.multi_reduction <add>, %134, %cst_53 [1] : vector<16x32xf32> to vector<16xf32>
    %136 = vector.shape_cast %135 : vector<16xf32> to vector<16x1xf32>
    %cst_54 = arith.constant 3.200000e+01 : f32
    %137 = vector.broadcast %cst_54 : f32 to vector<16x1xf32>
    %138 = arith.divf %136, %137 : vector<16x1xf32>
    %cst_55 = arith.constant 9.99999974E-6 : f32
    %139 = vector.broadcast %cst_55 : f32 to vector<16x1xf32>
    %140 = arith.addf %138, %139 : vector<16x1xf32>
    %141 = math.rsqrt %140 : vector<16x1xf32>
    %142 = vector.broadcast %141 : vector<16x1xf32> to vector<16x32xf32>
    %143 = arith.mulf %133, %142 : vector<16x32xf32>
    %144 = vector.broadcast %126 : vector<1x32xf32> to vector<16x32xf32>
    %145 = arith.mulf %143, %144 : vector<16x32xf32>
    %146 = vector.broadcast %127 : vector<1x32xf32> to vector<16x32xf32>
    %147 = arith.addf %145, %146 : vector<16x32xf32>
    %c0_56 = arith.constant 0 : index
    %c0_57 = arith.constant 0 : index
    %148 = vector.load %arg11[%c0_56, %c0_57] : memref<64x128xf32, #tpu.memory_space<vmem>>, vector<32x128xf32>
    %c0_58 = arith.constant 0 : index
    %c0_59 = arith.constant 0 : index
    %149 = vector.load %arg12[%c0_58, %c0_59] : memref<2x128xf32, #tpu.memory_space<vmem>>, vector<1x128xf32>
    %cst_60 = arith.constant dense<0.000000e+00> : vector<16x128xf32>
    %150 = tpu.matmul %147, %148, %cst_60 {dimension_numbers = #tpu.dot_dimension_numbers<[1], [0], [0], [1], [0, 0, 1, 1], [], []>} : vector<16x32xf32>, vector<32x128xf32>, vector<16x128xf32> -> vector<16x128xf32>
    %151 = vector.broadcast %149 : vector<1x128xf32> to vector<16x128xf32>
    %152 = arith.addf %150, %151 : vector<16x128xf32>
    %cst_61 = arith.constant 5.000000e-01 : f32
    %153 = vector.broadcast %cst_61 : f32 to vector<16x128xf32>
    %154 = arith.mulf %153, %152 : vector<16x128xf32>
    %cst_62 = arith.constant 4.471500e-02 : f32
    %155 = vector.broadcast %cst_62 : f32 to vector<16x128xf32>
    %156 = arith.mulf %155, %152 : vector<16x128xf32>
    %157 = arith.mulf %156, %152 : vector<16x128xf32>
    %158 = arith.mulf %157, %152 : vector<16x128xf32>
    %159 = arith.addf %152, %158 : vector<16x128xf32>
    %cst_63 = arith.constant 0.797884583 : f32
    %160 = vector.broadcast %cst_63 : f32 to vector<16x128xf32>
    %161 = arith.mulf %160, %159 : vector<16x128xf32>
    %162 = math.tanh %161 : vector<16x128xf32>
    %cst_64 = arith.constant 1.000000e+00 : f32
    %163 = vector.broadcast %cst_64 : f32 to vector<16x128xf32>
    %164 = arith.addf %163, %162 : vector<16x128xf32>
    %165 = arith.mulf %154, %164 : vector<16x128xf32>
    %c0_65 = arith.constant 0 : index
    %c0_66 = arith.constant 0 : index
    %166 = vector.load %arg13[%c0_65, %c0_66] : memref<256x32xf32, #tpu.memory_space<vmem>>, vector<128x32xf32>
    %c0_67 = arith.constant 0 : index
    %c0_68 = arith.constant 0 : index
    %167 = vector.load %arg14[%c0_67, %c0_68] : memref<2x32xf32, #tpu.memory_space<vmem>>, vector<1x32xf32>
    %cst_69 = arith.constant dense<0.000000e+00> : vector<16x32xf32>
    %168 = tpu.matmul %165, %166, %cst_69 {dimension_numbers = #tpu.dot_dimension_numbers<[1], [0], [0], [1], [0, 0, 1, 1], [], []>} : vector<16x128xf32>, vector<128x32xf32>, vector<16x32xf32> -> vector<16x32xf32>
    %169 = arith.addf %125, %168 : vector<16x32xf32>
    %170 = vector.broadcast %167 : vector<1x32xf32> to vector<16x32xf32>
    %171 = arith.addf %169, %170 : vector<16x32xf32>
    %c1 = arith.constant 1 : index
    %c0_70 = arith.constant 0 : index
    %172 = vector.load %arg3[%c1, %c0_70] : memref<2x32xf32, #tpu.memory_space<vmem>>, vector<1x32xf32>
    %c1_71 = arith.constant 1 : index
    %c0_72 = arith.constant 0 : index
    %173 = vector.load %arg4[%c1_71, %c0_72] : memref<2x32xf32, #tpu.memory_space<vmem>>, vector<1x32xf32>
    %cst_73 = arith.constant dense<0.000000e+00> : vector<16xf32>
    %174 = vector.multi_reduction <add>, %171, %cst_73 [1] : vector<16x32xf32> to vector<16xf32>
    %175 = vector.shape_cast %174 : vector<16xf32> to vector<16x1xf32>
    %cst_74 = arith.constant 3.200000e+01 : f32
    %176 = vector.broadcast %cst_74 : f32 to vector<16x1xf32>
    %177 = arith.divf %175, %176 : vector<16x1xf32>
    %178 = vector.broadcast %177 : vector<16x1xf32> to vector<16x32xf32>
    %179 = arith.subf %171, %178 : vector<16x32xf32>
    %180 = arith.mulf %179, %179 : vector<16x32xf32>
    %cst_75 = arith.constant dense<0.000000e+00> : vector<16xf32>
    %181 = vector.multi_reduction <add>, %180, %cst_75 [1] : vector<16x32xf32> to vector<16xf32>
    %182 = vector.shape_cast %181 : vector<16xf32> to vector<16x1xf32>
    %cst_76 = arith.constant 3.200000e+01 : f32
    %183 = vector.broadcast %cst_76 : f32 to vector<16x1xf32>
    %184 = arith.divf %182, %183 : vector<16x1xf32>
    %cst_77 = arith.constant 9.99999974E-6 : f32
    %185 = vector.broadcast %cst_77 : f32 to vector<16x1xf32>
    %186 = arith.addf %184, %185 : vector<16x1xf32>
    %187 = math.rsqrt %186 : vector<16x1xf32>
    %188 = vector.broadcast %187 : vector<16x1xf32> to vector<16x32xf32>
    %189 = arith.mulf %179, %188 : vector<16x32xf32>
    %190 = vector.broadcast %172 : vector<1x32xf32> to vector<16x32xf32>
    %191 = arith.mulf %189, %190 : vector<16x32xf32>
    %192 = vector.broadcast %173 : vector<1x32xf32> to vector<16x32xf32>
    %193 = arith.addf %191, %192 : vector<16x32xf32>
    %c32 = arith.constant 32 : index
    %c0_78 = arith.constant 0 : index
    %194 = vector.load %arg5[%c32, %c0_78] : memref<64x96xf32, #tpu.memory_space<vmem>>, vector<32x96xf32>
    %c1_79 = arith.constant 1 : index
    %c0_80 = arith.constant 0 : index
    %195 = vector.load %arg6[%c1_79, %c0_80] : memref<2x96xf32, #tpu.memory_space<vmem>>, vector<1x96xf32>
    %cst_81 = arith.constant dense<0.000000e+00> : vector<16x96xf32>
    %196 = tpu.matmul %193, %194, %cst_81 {dimension_numbers = #tpu.dot_dimension_numbers<[1], [0], [0], [1], [0, 0, 1, 1], [], []>} : vector<16x32xf32>, vector<32x96xf32>, vector<16x96xf32> -> vector<16x96xf32>
    %197 = vector.broadcast %195 : vector<1x96xf32> to vector<16x96xf32>
    %198 = arith.addf %196, %197 : vector<16x96xf32>
    %199 = vector.extract_strided_slice %198 {offsets = [0, 0], sizes = [16, 32], strides = [1, 1]} : vector<16x96xf32> to vector<16x32xf32>
    %200 = vector.extract_strided_slice %198 {offsets = [0, 32], sizes = [16, 32], strides = [1, 1]} : vector<16x96xf32> to vector<16x32xf32>
    %201 = vector.extract_strided_slice %198 {offsets = [0, 64], sizes = [16, 32], strides = [1, 1]} : vector<16x96xf32> to vector<16x32xf32>
    %202 = vector.extract_strided_slice %1 {offsets = [0, 0], sizes = [1, 8], strides = [1, 1]} : vector<2x8xf32> to vector<1x8xf32>
    %cst_82 = arith.constant 5.000000e-01 : f32
    %203 = vector.broadcast %cst_82 : f32 to vector<1x8xf32>
    %204 = arith.cmpf ogt, %202, %203 : vector<1x8xf32>
    %205 = vector.broadcast %204 : vector<1x8xi1> to vector<8x8xi1>
    %206 = arith.andi %4, %205 : vector<8x8xi1>
    %207 = vector.extract_strided_slice %199 {offsets = [0, 0], sizes = [8, 16], strides = [1, 1]} : vector<16x32xf32> to vector<8x16xf32>
    %cst_83 = arith.constant 2.500000e-01 : f32
    %208 = vector.broadcast %cst_83 : f32 to vector<8x16xf32>
    %209 = arith.mulf %207, %208 : vector<8x16xf32>
    %210 = vector.extract_strided_slice %200 {offsets = [0, 0], sizes = [8, 16], strides = [1, 1]} : vector<16x32xf32> to vector<8x16xf32>
    %211 = vector.extract_strided_slice %201 {offsets = [0, 0], sizes = [8, 16], strides = [1, 1]} : vector<16x32xf32> to vector<8x16xf32>
    %cst_84 = arith.constant dense<0.000000e+00> : vector<8x8xf32>
    %212 = tpu.matmul %209, %210, %cst_84 {dimension_numbers = #tpu.dot_dimension_numbers<[1], [1], [0], [0], [0, 0, 1, 0], [], []>} : vector<8x16xf32>, vector<8x16xf32>, vector<8x8xf32> -> vector<8x8xf32>
    %cst_85 = arith.constant -1.000000e+09 : f32
    %213 = vector.broadcast %cst_85 : f32 to vector<8x8xf32>
    %214 = arith.select %206, %212, %213 : vector<8x8xi1>, vector<8x8xf32>
    %cst_86 = arith.constant dense<0xFF800000> : vector<8xf32>
    %215 = vector.multi_reduction <maximumf>, %214, %cst_86 [1] : vector<8x8xf32> to vector<8xf32>
    %216 = vector.shape_cast %215 : vector<8xf32> to vector<8x1xf32>
    %217 = vector.broadcast %216 : vector<8x1xf32> to vector<8x8xf32>
    %218 = arith.subf %214, %217 : vector<8x8xf32>
    %219 = math.exp %218 : vector<8x8xf32>
    %cst_87 = arith.constant dense<0.000000e+00> : vector<8xf32>
    %220 = vector.multi_reduction <add>, %219, %cst_87 [1] : vector<8x8xf32> to vector<8xf32>
    %221 = vector.shape_cast %220 : vector<8xf32> to vector<8x1xf32>
    %222 = vector.broadcast %221 : vector<8x1xf32> to vector<8x8xf32>
    %223 = arith.divf %219, %222 : vector<8x8xf32>
    %cst_88 = arith.constant dense<0.000000e+00> : vector<8x16xf32>
    %224 = tpu.matmul %223, %211, %cst_88 {dimension_numbers = #tpu.dot_dimension_numbers<[1], [0], [0], [1], [0, 0, 1, 1], [], []>} : vector<8x8xf32>, vector<8x16xf32>, vector<8x16xf32> -> vector<8x16xf32>
    %225 = vector.extract_strided_slice %199 {offsets = [0, 16], sizes = [8, 16], strides = [1, 1]} : vector<16x32xf32> to vector<8x16xf32>
    %cst_89 = arith.constant 2.500000e-01 : f32
    %226 = vector.broadcast %cst_89 : f32 to vector<8x16xf32>
    %227 = arith.mulf %225, %226 : vector<8x16xf32>
    %228 = vector.extract_strided_slice %200 {offsets = [0, 16], sizes = [8, 16], strides = [1, 1]} : vector<16x32xf32> to vector<8x16xf32>
    %229 = vector.extract_strided_slice %201 {offsets = [0, 16], sizes = [8, 16], strides = [1, 1]} : vector<16x32xf32> to vector<8x16xf32>
    %cst_90 = arith.constant dense<0.000000e+00> : vector<8x8xf32>
    %230 = tpu.matmul %227, %228, %cst_90 {dimension_numbers = #tpu.dot_dimension_numbers<[1], [1], [0], [0], [0, 0, 1, 0], [], []>} : vector<8x16xf32>, vector<8x16xf32>, vector<8x8xf32> -> vector<8x8xf32>
    %cst_91 = arith.constant -1.000000e+09 : f32
    %231 = vector.broadcast %cst_91 : f32 to vector<8x8xf32>
    %232 = arith.select %206, %230, %231 : vector<8x8xi1>, vector<8x8xf32>
    %cst_92 = arith.constant dense<0xFF800000> : vector<8xf32>
    %233 = vector.multi_reduction <maximumf>, %232, %cst_92 [1] : vector<8x8xf32> to vector<8xf32>
    %234 = vector.shape_cast %233 : vector<8xf32> to vector<8x1xf32>
    %235 = vector.broadcast %234 : vector<8x1xf32> to vector<8x8xf32>
    %236 = arith.subf %232, %235 : vector<8x8xf32>
    %237 = math.exp %236 : vector<8x8xf32>
    %cst_93 = arith.constant dense<0.000000e+00> : vector<8xf32>
    %238 = vector.multi_reduction <add>, %237, %cst_93 [1] : vector<8x8xf32> to vector<8xf32>
    %239 = vector.shape_cast %238 : vector<8xf32> to vector<8x1xf32>
    %240 = vector.broadcast %239 : vector<8x1xf32> to vector<8x8xf32>
    %241 = arith.divf %237, %240 : vector<8x8xf32>
    %cst_94 = arith.constant dense<0.000000e+00> : vector<8x16xf32>
    %242 = tpu.matmul %241, %229, %cst_94 {dimension_numbers = #tpu.dot_dimension_numbers<[1], [0], [0], [1], [0, 0, 1, 1], [], []>} : vector<8x8xf32>, vector<8x16xf32>, vector<8x16xf32> -> vector<8x16xf32>
    %243 = tpu.concatenate %224, %242 in 1 : vector<8x16xf32>, vector<8x16xf32> -> vector<8x32xf32>
    %244 = vector.extract_strided_slice %1 {offsets = [1, 0], sizes = [1, 8], strides = [1, 1]} : vector<2x8xf32> to vector<1x8xf32>
    %cst_95 = arith.constant 5.000000e-01 : f32
    %245 = vector.broadcast %cst_95 : f32 to vector<1x8xf32>
    %246 = arith.cmpf ogt, %244, %245 : vector<1x8xf32>
    %247 = vector.broadcast %246 : vector<1x8xi1> to vector<8x8xi1>
    %248 = arith.andi %4, %247 : vector<8x8xi1>
    %249 = vector.extract_strided_slice %199 {offsets = [8, 0], sizes = [8, 16], strides = [1, 1]} : vector<16x32xf32> to vector<8x16xf32>
    %cst_96 = arith.constant 2.500000e-01 : f32
    %250 = vector.broadcast %cst_96 : f32 to vector<8x16xf32>
    %251 = arith.mulf %249, %250 : vector<8x16xf32>
    %252 = vector.extract_strided_slice %200 {offsets = [8, 0], sizes = [8, 16], strides = [1, 1]} : vector<16x32xf32> to vector<8x16xf32>
    %253 = vector.extract_strided_slice %201 {offsets = [8, 0], sizes = [8, 16], strides = [1, 1]} : vector<16x32xf32> to vector<8x16xf32>
    %cst_97 = arith.constant dense<0.000000e+00> : vector<8x8xf32>
    %254 = tpu.matmul %251, %252, %cst_97 {dimension_numbers = #tpu.dot_dimension_numbers<[1], [1], [0], [0], [0, 0, 1, 0], [], []>} : vector<8x16xf32>, vector<8x16xf32>, vector<8x8xf32> -> vector<8x8xf32>
    %cst_98 = arith.constant -1.000000e+09 : f32
    %255 = vector.broadcast %cst_98 : f32 to vector<8x8xf32>
    %256 = arith.select %248, %254, %255 : vector<8x8xi1>, vector<8x8xf32>
    %cst_99 = arith.constant dense<0xFF800000> : vector<8xf32>
    %257 = vector.multi_reduction <maximumf>, %256, %cst_99 [1] : vector<8x8xf32> to vector<8xf32>
    %258 = vector.shape_cast %257 : vector<8xf32> to vector<8x1xf32>
    %259 = vector.broadcast %258 : vector<8x1xf32> to vector<8x8xf32>
    %260 = arith.subf %256, %259 : vector<8x8xf32>
    %261 = math.exp %260 : vector<8x8xf32>
    %cst_100 = arith.constant dense<0.000000e+00> : vector<8xf32>
    %262 = vector.multi_reduction <add>, %261, %cst_100 [1] : vector<8x8xf32> to vector<8xf32>
    %263 = vector.shape_cast %262 : vector<8xf32> to vector<8x1xf32>
    %264 = vector.broadcast %263 : vector<8x1xf32> to vector<8x8xf32>
    %265 = arith.divf %261, %264 : vector<8x8xf32>
    %cst_101 = arith.constant dense<0.000000e+00> : vector<8x16xf32>
    %266 = tpu.matmul %265, %253, %cst_101 {dimension_numbers = #tpu.dot_dimension_numbers<[1], [0], [0], [1], [0, 0, 1, 1], [], []>} : vector<8x8xf32>, vector<8x16xf32>, vector<8x16xf32> -> vector<8x16xf32>
    %267 = vector.extract_strided_slice %199 {offsets = [8, 16], sizes = [8, 16], strides = [1, 1]} : vector<16x32xf32> to vector<8x16xf32>
    %cst_102 = arith.constant 2.500000e-01 : f32
    %268 = vector.broadcast %cst_102 : f32 to vector<8x16xf32>
    %269 = arith.mulf %267, %268 : vector<8x16xf32>
    %270 = vector.extract_strided_slice %200 {offsets = [8, 16], sizes = [8, 16], strides = [1, 1]} : vector<16x32xf32> to vector<8x16xf32>
    %271 = vector.extract_strided_slice %201 {offsets = [8, 16], sizes = [8, 16], strides = [1, 1]} : vector<16x32xf32> to vector<8x16xf32>
    %cst_103 = arith.constant dense<0.000000e+00> : vector<8x8xf32>
    %272 = tpu.matmul %269, %270, %cst_103 {dimension_numbers = #tpu.dot_dimension_numbers<[1], [1], [0], [0], [0, 0, 1, 0], [], []>} : vector<8x16xf32>, vector<8x16xf32>, vector<8x8xf32> -> vector<8x8xf32>
    %cst_104 = arith.constant -1.000000e+09 : f32
    %273 = vector.broadcast %cst_104 : f32 to vector<8x8xf32>
    %274 = arith.select %248, %272, %273 : vector<8x8xi1>, vector<8x8xf32>
    %cst_105 = arith.constant dense<0xFF800000> : vector<8xf32>
    %275 = vector.multi_reduction <maximumf>, %274, %cst_105 [1] : vector<8x8xf32> to vector<8xf32>
    %276 = vector.shape_cast %275 : vector<8xf32> to vector<8x1xf32>
    %277 = vector.broadcast %276 : vector<8x1xf32> to vector<8x8xf32>
    %278 = arith.subf %274, %277 : vector<8x8xf32>
    %279 = math.exp %278 : vector<8x8xf32>
    %cst_106 = arith.constant dense<0.000000e+00> : vector<8xf32>
    %280 = vector.multi_reduction <add>, %279, %cst_106 [1] : vector<8x8xf32> to vector<8xf32>
    %281 = vector.shape_cast %280 : vector<8xf32> to vector<8x1xf32>
    %282 = vector.broadcast %281 : vector<8x1xf32> to vector<8x8xf32>
    %283 = arith.divf %279, %282 : vector<8x8xf32>
    %cst_107 = arith.constant dense<0.000000e+00> : vector<8x16xf32>
    %284 = tpu.matmul %283, %271, %cst_107 {dimension_numbers = #tpu.dot_dimension_numbers<[1], [0], [0], [1], [0, 0, 1, 1], [], []>} : vector<8x8xf32>, vector<8x16xf32>, vector<8x16xf32> -> vector<8x16xf32>
    %285 = tpu.concatenate %266, %284 in 1 : vector<8x16xf32>, vector<8x16xf32> -> vector<8x32xf32>
    %286 = tpu.concatenate %243, %285 in 0 : vector<8x32xf32>, vector<8x32xf32> -> vector<16x32xf32>
    %c32_108 = arith.constant 32 : index
    %c0_109 = arith.constant 0 : index
    %287 = vector.load %arg7[%c32_108, %c0_109] : memref<64x32xf32, #tpu.memory_space<vmem>>, vector<32x32xf32>
    %c1_110 = arith.constant 1 : index
    %c0_111 = arith.constant 0 : index
    %288 = vector.load %arg8[%c1_110, %c0_111] : memref<2x32xf32, #tpu.memory_space<vmem>>, vector<1x32xf32>
    %cst_112 = arith.constant dense<0.000000e+00> : vector<16x32xf32>
    %289 = tpu.matmul %286, %287, %cst_112 {dimension_numbers = #tpu.dot_dimension_numbers<[1], [0], [0], [1], [0, 0, 1, 1], [], []>} : vector<16x32xf32>, vector<32x32xf32>, vector<16x32xf32> -> vector<16x32xf32>
    %290 = arith.addf %171, %289 : vector<16x32xf32>
    %291 = vector.broadcast %288 : vector<1x32xf32> to vector<16x32xf32>
    %292 = arith.addf %290, %291 : vector<16x32xf32>
    %c1_113 = arith.constant 1 : index
    %c0_114 = arith.constant 0 : index
    %293 = vector.load %arg9[%c1_113, %c0_114] : memref<2x32xf32, #tpu.memory_space<vmem>>, vector<1x32xf32>
    %c1_115 = arith.constant 1 : index
    %c0_116 = arith.constant 0 : index
    %294 = vector.load %arg10[%c1_115, %c0_116] : memref<2x32xf32, #tpu.memory_space<vmem>>, vector<1x32xf32>
    %cst_117 = arith.constant dense<0.000000e+00> : vector<16xf32>
    %295 = vector.multi_reduction <add>, %292, %cst_117 [1] : vector<16x32xf32> to vector<16xf32>
    %296 = vector.shape_cast %295 : vector<16xf32> to vector<16x1xf32>
    %cst_118 = arith.constant 3.200000e+01 : f32
    %297 = vector.broadcast %cst_118 : f32 to vector<16x1xf32>
    %298 = arith.divf %296, %297 : vector<16x1xf32>
    %299 = vector.broadcast %298 : vector<16x1xf32> to vector<16x32xf32>
    %300 = arith.subf %292, %299 : vector<16x32xf32>
    %301 = arith.mulf %300, %300 : vector<16x32xf32>
    %cst_119 = arith.constant dense<0.000000e+00> : vector<16xf32>
    %302 = vector.multi_reduction <add>, %301, %cst_119 [1] : vector<16x32xf32> to vector<16xf32>
    %303 = vector.shape_cast %302 : vector<16xf32> to vector<16x1xf32>
    %cst_120 = arith.constant 3.200000e+01 : f32
    %304 = vector.broadcast %cst_120 : f32 to vector<16x1xf32>
    %305 = arith.divf %303, %304 : vector<16x1xf32>
    %cst_121 = arith.constant 9.99999974E-6 : f32
    %306 = vector.broadcast %cst_121 : f32 to vector<16x1xf32>
    %307 = arith.addf %305, %306 : vector<16x1xf32>
    %308 = math.rsqrt %307 : vector<16x1xf32>
    %309 = vector.broadcast %308 : vector<16x1xf32> to vector<16x32xf32>
    %310 = arith.mulf %300, %309 : vector<16x32xf32>
    %311 = vector.broadcast %293 : vector<1x32xf32> to vector<16x32xf32>
    %312 = arith.mulf %310, %311 : vector<16x32xf32>
    %313 = vector.broadcast %294 : vector<1x32xf32> to vector<16x32xf32>
    %314 = arith.addf %312, %313 : vector<16x32xf32>
    %c32_122 = arith.constant 32 : index
    %c0_123 = arith.constant 0 : index
    %315 = vector.load %arg11[%c32_122, %c0_123] : memref<64x128xf32, #tpu.memory_space<vmem>>, vector<32x128xf32>
    %c1_124 = arith.constant 1 : index
    %c0_125 = arith.constant 0 : index
    %316 = vector.load %arg12[%c1_124, %c0_125] : memref<2x128xf32, #tpu.memory_space<vmem>>, vector<1x128xf32>
    %cst_126 = arith.constant dense<0.000000e+00> : vector<16x128xf32>
    %317 = tpu.matmul %314, %315, %cst_126 {dimension_numbers = #tpu.dot_dimension_numbers<[1], [0], [0], [1], [0, 0, 1, 1], [], []>} : vector<16x32xf32>, vector<32x128xf32>, vector<16x128xf32> -> vector<16x128xf32>
    %318 = vector.broadcast %316 : vector<1x128xf32> to vector<16x128xf32>
    %319 = arith.addf %317, %318 : vector<16x128xf32>
    %cst_127 = arith.constant 5.000000e-01 : f32
    %320 = vector.broadcast %cst_127 : f32 to vector<16x128xf32>
    %321 = arith.mulf %320, %319 : vector<16x128xf32>
    %cst_128 = arith.constant 4.471500e-02 : f32
    %322 = vector.broadcast %cst_128 : f32 to vector<16x128xf32>
    %323 = arith.mulf %322, %319 : vector<16x128xf32>
    %324 = arith.mulf %323, %319 : vector<16x128xf32>
    %325 = arith.mulf %324, %319 : vector<16x128xf32>
    %326 = arith.addf %319, %325 : vector<16x128xf32>
    %cst_129 = arith.constant 0.797884583 : f32
    %327 = vector.broadcast %cst_129 : f32 to vector<16x128xf32>
    %328 = arith.mulf %327, %326 : vector<16x128xf32>
    %329 = math.tanh %328 : vector<16x128xf32>
    %cst_130 = arith.constant 1.000000e+00 : f32
    %330 = vector.broadcast %cst_130 : f32 to vector<16x128xf32>
    %331 = arith.addf %330, %329 : vector<16x128xf32>
    %332 = arith.mulf %321, %331 : vector<16x128xf32>
    %c128 = arith.constant 128 : index
    %c0_131 = arith.constant 0 : index
    %333 = vector.load %arg13[%c128, %c0_131] : memref<256x32xf32, #tpu.memory_space<vmem>>, vector<128x32xf32>
    %c1_132 = arith.constant 1 : index
    %c0_133 = arith.constant 0 : index
    %334 = vector.load %arg14[%c1_132, %c0_133] : memref<2x32xf32, #tpu.memory_space<vmem>>, vector<1x32xf32>
    %cst_134 = arith.constant dense<0.000000e+00> : vector<16x32xf32>
    %335 = tpu.matmul %332, %333, %cst_134 {dimension_numbers = #tpu.dot_dimension_numbers<[1], [0], [0], [1], [0, 0, 1, 1], [], []>} : vector<16x128xf32>, vector<128x32xf32>, vector<16x32xf32> -> vector<16x32xf32>
    %336 = arith.addf %292, %335 : vector<16x32xf32>
    %337 = vector.broadcast %334 : vector<1x32xf32> to vector<16x32xf32>
    %338 = arith.addf %336, %337 : vector<16x32xf32>
    %c0_135 = arith.constant 0 : index
    %c0_136 = arith.constant 0 : index
    %339 = vector.load %arg15[%c0_135, %c0_136] : memref<1x32xf32, #tpu.memory_space<vmem>>, vector<1x32xf32>
    %c0_137 = arith.constant 0 : index
    %c0_138 = arith.constant 0 : index
    %340 = vector.load %arg16[%c0_137, %c0_138] : memref<1x32xf32, #tpu.memory_space<vmem>>, vector<1x32xf32>
    %cst_139 = arith.constant dense<0.000000e+00> : vector<16xf32>
    %341 = vector.multi_reduction <add>, %338, %cst_139 [1] : vector<16x32xf32> to vector<16xf32>
    %342 = vector.shape_cast %341 : vector<16xf32> to vector<16x1xf32>
    %cst_140 = arith.constant 3.200000e+01 : f32
    %343 = vector.broadcast %cst_140 : f32 to vector<16x1xf32>
    %344 = arith.divf %342, %343 : vector<16x1xf32>
    %345 = vector.broadcast %344 : vector<16x1xf32> to vector<16x32xf32>
    %346 = arith.subf %338, %345 : vector<16x32xf32>
    %347 = arith.mulf %346, %346 : vector<16x32xf32>
    %cst_141 = arith.constant dense<0.000000e+00> : vector<16xf32>
    %348 = vector.multi_reduction <add>, %347, %cst_141 [1] : vector<16x32xf32> to vector<16xf32>
    %349 = vector.shape_cast %348 : vector<16xf32> to vector<16x1xf32>
    %cst_142 = arith.constant 3.200000e+01 : f32
    %350 = vector.broadcast %cst_142 : f32 to vector<16x1xf32>
    %351 = arith.divf %349, %350 : vector<16x1xf32>
    %cst_143 = arith.constant 9.99999974E-6 : f32
    %352 = vector.broadcast %cst_143 : f32 to vector<16x1xf32>
    %353 = arith.addf %351, %352 : vector<16x1xf32>
    %354 = math.rsqrt %353 : vector<16x1xf32>
    %355 = vector.broadcast %354 : vector<16x1xf32> to vector<16x32xf32>
    %356 = arith.mulf %346, %355 : vector<16x32xf32>
    %357 = vector.broadcast %339 : vector<1x32xf32> to vector<16x32xf32>
    %358 = arith.mulf %356, %357 : vector<16x32xf32>
    %359 = vector.broadcast %340 : vector<1x32xf32> to vector<16x32xf32>
    %360 = arith.addf %358, %359 : vector<16x32xf32>
    %c0_144 = arith.constant 0 : index
    %c0_145 = arith.constant 0 : index
    %361 = vector.load %arg17[%c0_144, %c0_145] : memref<32x128xf32, #tpu.memory_space<vmem>>, vector<32x128xf32>
    %cst_146 = arith.constant dense<0.000000e+00> : vector<16x128xf32>
    %362 = tpu.matmul %360, %361, %cst_146 {dimension_numbers = #tpu.dot_dimension_numbers<[1], [0], [0], [1], [0, 0, 1, 1], [], []>} : vector<16x32xf32>, vector<32x128xf32>, vector<16x128xf32> -> vector<16x128xf32>
    %363 = vector.extract_strided_slice %362 {offsets = [7, 0], sizes = [1, 128], strides = [1, 1]} : vector<16x128xf32> to vector<1x128xf32>
    %364 = vector.extract_strided_slice %362 {offsets = [15, 0], sizes = [1, 128], strides = [1, 1]} : vector<16x128xf32> to vector<1x128xf32>
    %365 = tpu.concatenate %363, %364 in 0 : vector<1x128xf32>, vector<1x128xf32> -> vector<2x128xf32>
    %c0_147 = arith.constant 0 : index
    %c0_148 = arith.constant 0 : index
    %366 = vector.load %arg19[%c0_147, %c0_148] : memref<2x128xf32, #tpu.memory_space<vmem>>, vector<2x128xf32>
    tpu.vector_store %arg19[%c0_147, %c0_148], %365 {strides = array<i32>} : memref<2x128xf32, #tpu.memory_space<vmem>>, vector<2x128xf32>,
    %367 = vector.extract_strided_slice %362 {offsets = [0, 0], sizes = [7, 128], strides = [1, 1]} : vector<16x128xf32> to vector<7x128xf32>
    %368 = vector.extract_strided_slice %362 {offsets = [8, 0], sizes = [7, 128], strides = [1, 1]} : vector<16x128xf32> to vector<7x128xf32>
    %369 = tpu.concatenate %367, %368 in 0 : vector<7x128xf32>, vector<7x128xf32> -> vector<14x128xf32>
    %cst_149 = arith.constant dense<0xFF800000> : vector<14xf32>
    %370 = vector.multi_reduction <maximumf>, %369, %cst_149 [1] : vector<14x128xf32> to vector<14xf32>
    %371 = vector.shape_cast %370 : vector<14xf32> to vector<14x1xf32>
    %372 = vector.broadcast %371 : vector<14x1xf32> to vector<14x128xf32>
    %373 = arith.subf %369, %372 : vector<14x128xf32>
    %374 = math.exp %373 : vector<14x128xf32>
    %cst_150 = arith.constant dense<0.000000e+00> : vector<14xf32>
    %375 = vector.multi_reduction <add>, %374, %cst_150 [1] : vector<14x128xf32> to vector<14xf32>
    %376 = vector.shape_cast %375 : vector<14xf32> to vector<14x1xf32>
    %377 = math.log %376 : vector<14x1xf32>
    %378 = arith.addf %377, %371 : vector<14x1xf32>
    %c0_151 = arith.constant 0 : index
    %c0_152 = arith.constant 0 : index
    %379 = vector.load %arg2[%c0_151, %c0_152] : memref<14x128xf32, #tpu.memory_space<vmem>>, vector<14x128xf32>
    %380 = arith.mulf %369, %379 : vector<14x128xf32>
    %cst_153 = arith.constant dense<0.000000e+00> : vector<14xf32>
    %381 = vector.multi_reduction <add>, %380, %cst_153 [1] : vector<14x128xf32> to vector<14xf32>
    %382 = vector.shape_cast %381 : vector<14xf32> to vector<14x1xf32>
    %cst_154 = arith.constant dense<0.000000e+00> : vector<14xf32>
    %383 = vector.multi_reduction <add>, %379, %cst_154 [1] : vector<14x128xf32> to vector<14xf32>
    %384 = vector.shape_cast %383 : vector<14xf32> to vector<14x1xf32>
    %385 = arith.subf %378, %382 : vector<14x1xf32>
    %386 = arith.mulf %385, %384 : vector<14x1xf32>
    %cst_155 = arith.constant dense<0.000000e+00> : vector<1xf32>
    %387 = vector.multi_reduction <add>, %386, %cst_155 [0] : vector<14x1xf32> to vector<1xf32>
    %388 = vector.shape_cast %387 : vector<1xf32> to vector<1x1xf32>
    %cst_156 = arith.constant dense<0.000000e+00> : vector<1xf32>
    %389 = vector.multi_reduction <add>, %384, %cst_156 [0] : vector<14x1xf32> to vector<1xf32>
    %390 = vector.shape_cast %389 : vector<1xf32> to vector<1x1xf32>
    %cst_157 = arith.constant 1.000000e+00 : f32
    %391 = vector.broadcast %cst_157 : f32 to vector<1x1xf32>
    %392 = arith.maximumf %390, %391 : vector<1x1xf32>
    %393 = arith.divf %388, %392 : vector<1x1xf32>
    %c0_158 = arith.constant 0 : index
    %c0_159 = arith.constant 0 : index
    %394 = vector.load %arg18[%c0_158, %c0_159] : memref<1x1xf32, #tpu.memory_space<vmem>>, vector<1x1xf32>
    tpu.vector_store %arg18[%c0_158, %c0_159], %393 {strides = array<i32>} : memref<1x1xf32, #tpu.memory_space<vmem>>, vector<1x1xf32>,
    return
  }
}

</mosaic_0001>

<bundles_post_ra>
// kernel: eq.10
= control target key start
LH: loop header
LB: loop body
LE: loop exit
PB: predicated region body
PF: predicated region fallthrough
CT: control target
= control target key end

     0   :  { %vm7_vm0 = vcmask 56320   ;;  %vm13_vm1 = vcmask 113720   ;;  %s39_s0 = inlined_call_operand.vmem [shape: s32[2,7], index: 0, kind: input, shape index: {}]   ;;  %s40_s1 = inlined_call_operand.vmem [shape: s32[14], index: 1, kind: output, shape index: {}]  }
   0x1   :  { %v4_v0 = vld [vmem:[%s39_s0] sm:$0x3]  ;;  %s22_s0 = smov 7  }
   0x2   :  { %5 = vst [vmem:[#allocation1] sm:$0x3] %v4_v0 }
   0x9   :  { %v10_v1 = vld [vmem:[#allocation1 + $0x1] sm:$0x1]   ;;  %v6_v2 = vld [vmem:[#allocation1] sm:$0x1]  }
   0xa   :  { %11 = vrot.lane.b32.xlu0 %v10_v1, %s22_s0  ;;  %8 = vst.msk [vmem:[#allocation0] sm:$0x1] %vm7_vm0, %v6_v2  }
  0x7c   :  { %v12_v3 = vpop.permute.xlu0 %11  }
  0x7d   :  { %14 = vst.msk [vmem:[#allocation0] sm:$0x1] %vm13_vm1, %v12_v3  }
  0x84   :  { %v18_v4 = vld [vmem:[#allocation0] sm:$0x1] }
  0x85   :  { %20 = vst [vmem:[%s40_s1] sm:$0x1] %v18_v4 }

// kernel: gpt2_custom_loss_forward.1
= control target key start
LH: loop header
LB: loop body
LE: loop exit
PB: predicated region body
PF: predicated region fallthrough
CT: control target
= control target key end

     0   :  { %s3841_s0 = inlined_call_operand.vmem [shape: f32[16,32], index: 0, kind: input, shape index: {}]   ;;  %s3842_s1 = inlined_call_operand.vmem [shape: f32[2,8], index: 1, kind: input, shape index: {}]   ;;  %s3843_s2 = inlined_call_operand.vmem [shape: f32[14,128], index: 2, kind: input, shape index: {}]   ;;  %s3844_s3 = inlined_call_operand.vmem [shape: f32[2,32], index: 3, kind: input, shape index: {}]   ;;  %s3845_s4 = inlined_call_operand.vmem [shape: f32[2,32], index: 4, kind: input, shape index: {}]   ;;  %s3846_s5 = inlined_call_operand.vmem [shape: f32[64,96], index: 5, kind: input, shape index: {}]   ;;  %s3847_s6 = inlined_call_operand.vmem [shape: f32[2,96], index: 6, kind: input, shape index: {}]   ;;  %s3848_s7 = inlined_call_operand.vmem [shape: f32[64,32], index: 7, kind: input, shape index: {}]   ;;  %s3849_s8 = inlined_call_operand.vmem [shape: f32[2,32], index: 8, kind: input, shape index: {}]   ;;  %s3850_s9 = inlined_call_operand.vmem [shape: f32[2,32], index: 9, kind: input, shape index: {}]   ;;  %s3851_s10 = inlined_call_operand.vmem [shape: f32[2,32], index: 10, kind: input, shape index: {}]   ;;  %s3852_s11 = inlined_call_operand.vmem [shape: f32[64,128], index: 11, kind: input, shape index: {}]   ;;  %s3853_s12 = inlined_call_operand.vmem [shape: f32[2,128], index: 12, kind: input, shape index: {}]   ;;  %s3854_s13 = inlined_call_operand.vmem [shape: f32[256,32], index: 13, kind: input, shape index: {}]   ;;  %s3855_s14 = inlined_call_operand.vmem [shape: f32[2,32], index: 14, kind: input, shape index: {}]   ;;  %s3856_s15 = inlined_call_operand.vmem [shape: f32[1,32], index: 15, kind: input, shape index: {}]   ;;  %s3857_s16 = inlined_call_operand.vmem [shape: f32[1,32], index: 16, kind: input, shape index: {}]   ;;  %s3858_s17 = inlined_call_operand.vmem [shape: f32[32,128], index: 17, kind: input, shape index: {}]   ;;  %s3859_s18 = inlined_call_operand.hbm [shape: f32[1,1], index: 18, kind: output, shape index: {0}]   ;;  %s3860_s19 = inlined_call_operand.vmem [shape: f32[2,128], index: 19, kind: output, shape index: {1}]  }
   0x1   :  { %3868 = sst [smem:[#allocation5_spill]] %s3841_s0 }
   0x2   :  { %3869 = sst [smem:[#allocation6_spill]] %s3842_s1 }
   0x3   :  { %3870 = sst [smem:[#allocation7_spill]] %s3843_s2 }
   0x4   :  { %3871 = sst [smem:[#allocation8_spill]] %s3844_s3 }
   0x5   :  { %s3872_s20 = sld [smem:[#allocation5_spill]]  ;;  %vm72_vm0 = vcmask 261120  }
   0xb   :  { %v3336_v0 = vld [vmem:[%s3872_s20] sm:$0xff]  ;;  %v3341_v1 = vld [vmem:[%s3872_s20 + $0x8] sm:$0xff] }
   0xc   :  { %25 = vsyncpa [#allocation3], 0  ;;  %v73_v2 = vsel %vm72_vm0, %v3336_v0, 0.0  ;;  %v76_v3 = vsel %vm72_vm0, %v3341_v1, 0.0  ;;  %v112_v14 = vld [vmem:[%s3846_s5] sm:$0xff]  ;;  %v113_v15 = vld [vmem:[%s3846_s5 + $0x8] sm:$0xff]  ;;  %v65_v47 = vlaneseq }
   0xd   :  { %74 = vadd.xlane.f32.xlu0 %v73_v2  ;;  %v114_v16 = vld [vmem:[%s3846_s5 + $0x10] sm:$0xff]  ;;  %v2999_v17 = vpack.c.bf16 %v113_v15, %v112_v14  ;;  %v115_v18 = vld [vmem:[%s3846_s5 + $0x18] sm:$0xff]  ;;  %s3873_s0 = sld [smem:[#allocation8_spill]]  ;;  %v2607_v29 = vld [vmem:[%s3845_s4] ss:$0 sm:$0xff]  ;;  %v3223_v36 = vmov 0.0  }
   0xe   :  { %v3003_v19 = vpack.c.bf16 %v115_v18, %v114_v16  ;;  %2803 = vmatprep.subr.mxu0 %v3223_v36  ;;  %vm3224_vm1 = vmmov 0   ;;  %v2608_v37 = vld [vmem:[%s3847_s6] ss:$0 sm:$0xff]  ;;  %s3225_s22 = smov 96   ;;  %s3226_s2 = smov 80   ;;  %vm214_vm2 = vcmask 130048  }
   0xf   :  { %3000 = vmatprep.subr.bf16.mxu1 %v2999_v17  ;;  %2805 = vmatprep.mubr.msk.f32.mxu0 %vm3224_vm1, %v3223_v36  ;;  %s3227_s23 = smov 112   ;;  %s3874_s3 = sld [smem:[#allocation6_spill]]  ;;  %v66_v49 = vshrl.u32 %v65_v47, 7  ;;  %v3228_v51 = vmov 0   ;;  %v68_v53 = vand.u32 127, %v65_v47  ;;  %vm291_vm7 = vcmask 64512  }
  0x10   :  { %3002 = vmatpush3.bf16.msra.mxu1 %v2999_v17  ;;  %s3229_s26 = smov 64   ;;  %s3866_s27 = smov 48   ;;  %vm2528_vm10 = vcmask 1045504   ;;  %vm2524_vm11 = vcmask 1046528   ;;  %vm2519_vm12 = vcmask 1040384   ;;  %vm2586_vm13 = vcmask 0  }
  0x11   :  { %77 = vadd.xlane.f32.xlu0 %v76_v3  ;;  %3004 = vmatprep.subr.bf16.mxu1 %v3003_v19  ;;  %v206_v50 = vsub.s32 0, %v66_v49  ;;  %vm69_vm4 = vcmp.le.s32.totalorder %v68_v53, %v66_v49  ;;  %v552_v55 = vsub.s32 1, %v66_v49 }
  0x13   :  { %v2606_v27 = vld [vmem:[%s3873_s0] ss:$0 sm:$0xff] }
  0x14   :  { %3006 = vmatpush3.bf16.msra.mxu1 %v3003_v19 }
  0x15   :  { %2783 = vmatprep.subr.mxu1 %v3223_v36  ;;  %v64_v48 = vld [vmem:[%s3874_s3] sm:$0x3]  ;;  %s3864_s3 = smov 16  }
  0x16   :  { %vm202_vm3 = vcmp.gt.f32.partialorder %v64_v48, 0.5 }
  0x17   :  { %v203_v52 = vsel %vm202_vm3, 1, %v3228_v51 }
  0x18   :  { %v207_v54 = vrot.slane %v203_v52, %v206_v50  ;;  %v553_v57 = vrot.slane %v203_v52, %v552_v55  ;;  %v894_v55 = vld [vmem:[%s3848_s7] sm:$0xff] }
  0x1a   :  { %vm208_vm5 = vcmp.eq.s32.totalorder %v207_v54, 1  ;;  %vm554_vm8 = vcmp.eq.s32.totalorder %v553_v57, 1  ;;  %v895_v57 = vld [vmem:[%s3848_s7 + $0x8] sm:$0xff] }
  0x1b   :  { %vm3406_vm6 = vmand %vm69_vm4, %vm208_vm5 }
  0x1c   :  { %vm3413_vm9 = vmand %vm69_vm4, %vm554_vm8 }
  0x9a   :  { %v75_v4 = vpop.xlane.xlu0 %74 }
  0x9b   :  { %v80_v5 = vmul.f32 0.03125, %v75_v4 }
  0x9d   :  { %v82_v6 = vsub.f32 %v3336_v0, %v80_v5 }
  0x9e   :  { %v78_v7 = vpop.xlane.xlu0 %77 }
  0x9f   :  { %v81_v8 = vmul.f32 0.03125, %v78_v7  ;;  %v84_v9 = vmul.f32 %v82_v6, %v82_v6 }
  0xa1   :  { %v83_v10 = vsub.f32 %v3341_v1, %v81_v8  ;;  %v86_v11 = vsel %vm72_vm0, %v84_v9, 0.0 }
  0xa2   :  { %87 = vadd.xlane.f32.xlu1 %v86_v11 }
  0xa3   :  { %v85_v12 = vmul.f32 %v83_v10, %v83_v10 }
  0xa5   :  { %v89_v13 = vsel %vm72_vm0, %v85_v12, 0.0 }
  0xa6   :  { %90 = vadd.xlane.f32.xlu1 %v89_v13 }
 0x12f   :  { %v88_v20 = vpop.xlane.xlu1 %87 }
 0x130   :  { %v92_v21 = vmul.f32 0.03125, %v88_v20 }
 0x132   :  { %v94_v22 = vadd.f32 1e-05, %v92_v21 }
 0x133   :  { %v91_v23 = vpop.xlane.xlu1 %90 }
 0x134   :  { %3129 = vrsqrt.f32 %v94_v22  ;;  %v93_v24 = vmul.f32 0.03125, %v91_v23 }
 0x136   :  { %v95_v25 = vadd.f32 1e-05, %v93_v24 }
 0x138   :  { %3131 = vrsqrt.f32 %v95_v25 }
 0x13e   :  { %v3130_v26 = vpop.eup %3129 }
 0x13f   :  { %v98_v28 = vmul.f32 %v3130_v26, %v82_v6 }
 0x141   :  { %v104_v30 = vmul.f32 %v2606_v27, %v98_v28 }
 0x142   :  { %v3132_v31 = vpop.eup %3131 }
 0x143   :  { %v99_v32 = vmul.f32 %v3132_v31, %v83_v10  ;;  %v110_v33 = vadd.f32 %v2607_v29, %v104_v30 }
 0x145   :  { %v105_v34 = vmul.f32 %v2606_v27, %v99_v32  ;;  %2780 = vmatprep.mubr.msk.f32.mxu1 %vm72_vm0, %v110_v33 }
 0x147   :  { %v111_v35 = vadd.f32 %v2607_v29, %v105_v34 }
 0x149   :  { %2781 = vmatmul.mubr.msk.f32.vlgmr.msra.gmra.mrb[0].mxu1 %vm72_vm0, %v111_v35 }
 0x14a   :  { %2785 = vmatprep.mubr.msk.f32.mxu1 %vm3224_vm1, %v3223_v36 }
 0x21c   :  { %v2782_v38 = vpop.f32.mrb[0].mxu1 }
 0x21d   :  { %v193_v39 = vpop.f32.mrb[1].mxu1  ;;  %v3386_v41 = vadd.f32 %v2782_v38, %v2608_v37 }
 0x21e   :  { %v3380_v40 = vadd.f32 %v2608_v37, %v193_v39 }
 0x21f   :  { %v556_v42 = vmul.f32 0.25, %v3386_v41 }
 0x220   :  { %212 = vrot.lane.b32.xlu0 %v3380_v40, %s3225_s22  ;;  %v210_v44 = vmul.f32 0.25, %v3380_v40 }
 0x224   :  { %381 = vrot.lane.b32.xlu0 %v3380_v40, %s3226_s2 }
 0x228   :  { %558 = vrot.lane.b32.xlu0 %v3386_v41, %s3225_s22 }
 0x22c   :  { %723 = vrot.lane.b32.xlu0 %v556_v42, %s3227_s23 }
 0x292   :  { %v213_v43 = vpop.permute.xlu0 %212 }
 0x293   :  { %2784 = vmatpush3.xpose.msk.msra.mxu1 %vm214_vm2, %v213_v43 }
 0x294   :  { %2788 = vmatprep.subr.mxu1 %v3223_v36 }
 0x296   :  { %v382_v45 = vpop.permute.xlu0 %381  ;;  %2786 = vmatmul.mubr.msk.f32.vlgmr.msra.gmra.mrb[2].mxu1 %vm214_vm2, %v210_v44 }
 0x297   :  { %2790 = vmatprep.mubr.msk.f32.mxu1 %vm3224_vm1, %v3223_v36 }
 0x29a   :  { %v559_v46 = vpop.permute.xlu0 %558 }
 0x29b   :  { %2804 = vmatpush3.xpose.msk.msra.mxu0 %vm214_vm2, %v559_v46 }
 0x29c   :  { %2813 = vmatprep.subr.mxu0 %v3223_v36 }
 0x29e   :  { %2806 = vmatmul.mubr.msk.f32.vlgmr.msra.gmra.mrb[0].mxu0 %vm214_vm2, %v556_v42  ;;  %v724_v14 = vpop.permute.xlu0 %723 }
 0x29f   :  { %2815 = vmatprep.mubr.msk.f32.mxu0 %vm3224_vm1, %v3223_v36 }
 0x369   :  { %v286_v58 = vpop.f32.mrb[2].mxu1 }
 0x36a   :  { %v290_v59 = vsel %vm3406_vm6, %v286_v58, -1e+09  ;;  %v2787_v60 = vpop.f32.mrb[3].mxu1  ;;  %v3007_v58 = vpack.c.bf16 %v895_v57, %v894_v55  ;;  %v1139_v55 = vld [vmem:[%s3854_s13 + $0x18] sm:$0xff] }
 0x36b   :  { %v292_v61 = vsel %vm291_vm7, %v290_v59, -inf  ;;  %v897_v60 = vld [vmem:[%s3848_s7 + $0x18] sm:$0xff] }
 0x36c   :  { %293 = vmax.xlane.f32.xlu1 %v292_v61 }
 0x371   :  { %v631_v63 = vpop.f32.mrb[0].mxu0 }
 0x372   :  { %v635_v2 = vsel %vm3413_vm9, %v631_v63, -1e+09  ;;  %v2807_v3 = vpop.f32.mrb[1].mxu0 }
 0x373   :  { %v636_v4 = vsel %vm291_vm7, %v635_v2, -inf }
 0x374   :  { %637 = vmax.xlane.f32.xlu0 %v636_v4 }
 0x37d   :  { %303 = vrot.lane.b32.xlu1 %v3380_v40, %s3229_s26 }
 0x381   :  { %379 = vrot.lane.b32.xlu1 %v210_v44, %s3227_s23 }
 0x3f9   :  { %v294_v5 = vpop.xlane.xlu1 %293 }
 0x3fa   :  { %v295_v6 = vsub.f32 %v290_v59, %v294_v5  ;;  %v896_v59 = vld [vmem:[%s3848_s7 + $0x10] sm:$0xff] }
 0x3fb   :  { %v3011_v61 = vpack.c.bf16 %v897_v60, %v896_v59  ;;  %v1141_v59 = vld [vmem:[%s3854_s13 + $0x28] sm:$0xff] }
 0x3fc   :  { %v296_v7 = vmul.f32 1.442695, %v295_v6 }
 0x3fd   :  { %v304_v8 = vpop.permute.xlu1 %303 }
 0x3fe   :  { %3133 = vpow2.f32 %v296_v7  ;;  %2789 = vmatpush3.msra.mxu1 %v304_v8 }
 0x3ff   :  { %2793 = vmatprep.subr.mxu1 %v3223_v36 }
 0x401   :  { %v380_v11 = vpop.permute.xlu1 %379  ;;  %v638_v17 = vpop.xlane.xlu0 %637 }
 0x402   :  { %v639_v18 = vsub.f32 %v635_v2, %v638_v17 }
 0x404   :  { %v640_v19 = vmul.f32 1.442695, %v639_v18 }
 0x408   :  { %v3134_v9 = vpop.eup %3133 }
 0x409   :  { %v298_v10 = vsel %vm291_vm7, %v3134_v9, 0.0 }
 0x40a   :  { %299 = vadd.xlane.f32.xlu1 %v298_v10 }
 0x41b   :  { %725 = vrot.lane.b32.xlu1 %v3386_v41, %s3226_s2 }
 0x497   :  { %v300_v12 = vpop.xlane.xlu1 %299 }
 0x498   :  { %3135 = vrcp.f32 %v300_v12 }
 0x499   :  { %3137 = vpow2.f32 %v640_v19 }
 0x49b   :  { %v726_v13 = vpop.permute.xlu1 %725 }
 0x49c   :  { %2814 = vmatpush3.xpose.msk.msra.mxu0 %vm214_vm2, %v726_v13 }
 0x49d   :  { %3008 = vmatprep.subr.bf16.mxu0 %v3007_v58 }
 0x49f   :  { %2816 = vmatmul.mubr.msk.f32.vlgmr.msra.gmra.mrb[2].mxu0 %vm214_vm2, %v724_v14 }
 0x4a0   :  { %3010 = vmatpush3.bf16.msra.mxu0 %v3007_v58  ;;  %v1140_v58 = vld [vmem:[%s3854_s13 + $0x20] sm:$0xff] }
 0x4a1   :  { %3012 = vmatprep.subr.bf16.mxu0 %v3011_v61  ;;  %v3031_v60 = vpack.c.bf16 %v1141_v59, %v1140_v58  ;;  %v1277_v58 = vld [vmem:[%s3846_s5 + $0x28] sm:$0xff] }
 0x4a2   :  { %v3136_v15 = vpop.eup %3135 }
 0x4a3   :  { %v302_v16 = vmul.f32 %v3136_v15, %v3134_v9  ;;  %v3138_v30 = vpop.eup %3137 }
 0x4a4   :  { %v642_v31 = vsel %vm291_vm7, %v3138_v30, 0.0  ;;  %3014 = vmatpush3.bf16.msra.mxu0 %v3011_v61  ;;  %v1142_v61 = vld [vmem:[%s3854_s13 + $0x30] sm:$0xff] }
 0x4a5   :  { %2791 = vmatmul.mubr.msk.f32.vlgmr.msra.gmra.mrb[4].mxu1 %vm291_vm7, %v302_v16 }
 0x4a6   :  { %2794 = vmatpush3.xpose.msk.msra.mxu1 %vm214_vm2, %v382_v45  ;;  %2795 = vmatprep.mubr.msk.f32.mxu1 %vm3224_vm1, %v3223_v36 }
 0x4a7   :  { %2798 = vmatprep.subr.mxu1 %v3223_v36 }
 0x4a9   :  { %2796 = vmatmul.mubr.msk.f32.vlgmr.msra.gmra.mrb[6].mxu1 %vm214_vm2, %v380_v11  ;;  %v2625_v11 = vld [vmem:[%s3849_s8] ss:$0 sm:$0xff] }
 0x4aa   :  { %2800 = vmatprep.mubr.msk.f32.mxu1 %vm3224_vm1, %v3223_v36 }
 0x572   :  { %v797_v20 = vpop.f32.mrb[2].mxu0 }
 0x573   :  { %v801_v21 = vsel %vm3413_vm9, %v797_v20, -1e+09  ;;  %v2817_v22 = vpop.f32.mrb[3].mxu0 }
 0x574   :  { %v802_v23 = vsel %vm291_vm7, %v801_v21, -inf }
 0x575   :  { %803 = vmax.xlane.f32.xlu0 %v802_v23 }
 0x578   :  { %v3440_v24 = vpop.f32.mrb[4].mxu1 }
 0x579   :  { %v2792_v25 = vpop.f32.mrb[5].mxu1 }
 0x57c   :  { %v453_v26 = vpop.f32.mrb[6].mxu1 }
 0x57d   :  { %v457_v27 = vsel %vm3406_vm6, %v453_v26, -1e+09  ;;  %v2797_v28 = vpop.f32.mrb[7].mxu1 }
 0x57e   :  { %v458_v29 = vsel %vm291_vm7, %v457_v27, -inf  ;;  %v1028_v28 = vld [vmem:[%s3852_s11] sm:$0xff] }
 0x57f   :  { %459 = vmax.xlane.f32.xlu1 %v458_v29  ;;  %v1029_v29 = vld [vmem:[%s3852_s11 + $0x8] sm:$0xff] }
 0x583   :  { %643 = vadd.xlane.f32.xlu1 %v642_v31  ;;  %v1030_v31 = vld [vmem:[%s3852_s11 + $0x10] sm:$0xff] }
 0x594   :  { %469 = vrot.lane.b32.xlu1 %v3380_v40, %s3866_s27 }
 0x598   :  { %813 = vrot.lane.b32.xlu1 %v3386_v41, %s3866_s27 }
 0x602   :  { %v804_v32 = vpop.xlane.xlu0 %803 }
 0x603   :  { %v805_v33 = vsub.f32 %v801_v21, %v804_v32  ;;  %v1031_v32 = vld [vmem:[%s3852_s11 + $0x18] sm:$0xff] }
 0x605   :  { %v806_v34 = vmul.f32 1.442695, %v805_v33  ;;  %v3019_v33 = vpack.c.bf16 %v1031_v32, %v1030_v31 }
 0x607   :  { %3139 = vpow2.f32 %v806_v34  ;;  %v1136_v34 = vld [vmem:[%s3854_s13] sm:$0xff] }
 0x60c   :  { %v460_v35 = vpop.xlane.xlu1 %459 }
 0x60d   :  { %v461_v37 = vsub.f32 %v457_v27, %v460_v35  ;;  %v1137_v35 = vld [vmem:[%s3854_s13 + $0x8] sm:$0xff] }
 0x60f   :  { %v462_v38 = vmul.f32 1.442695, %v461_v37  ;;  %v3023_v37 = vpack.c.bf16 %v1137_v35, %v1136_v34 }
 0x610   :  { %v644_v39 = vpop.xlane.xlu1 %643 }
 0x611   :  { %v3140_v42 = vpop.eup %3139  ;;  %3141 = vpow2.f32 %v462_v38  ;;  %3024 = vmatprep.subr.bf16.mxu0 %v3023_v37 }
 0x612   :  { %v808_v43 = vsel %vm291_vm7, %v3140_v42, 0.0 }
 0x613   :  { %809 = vadd.xlane.f32.xlu0 %v808_v43 }
 0x614   :  { %v470_v44 = vpop.permute.xlu1 %469 }
 0x615   :  { %2799 = vmatpush3.msra.mxu1 %v470_v44 }
 0x616   :  { %2808 = vmatprep.subr.mxu1 %v3223_v36 }
 0x61b   :  { %v3142_v40 = vpop.eup %3141 }
 0x61c   :  { %v464_v45 = vsel %vm291_vm7, %v3142_v40, 0.0 }
 0x61d   :  { %465 = vadd.xlane.f32.xlu0 %v464_v45 }
 0x633   :  { %647 = vrot.lane.b32.xlu0 %v3386_v41, %s3229_s26  ;;  %v814_v41 = vpop.permute.xlu1 %813 }
 0x6a0   :  { %v810_v46 = vpop.xlane.xlu0 %809 }
 0x6aa   :  { %v466_v47 = vpop.xlane.xlu0 %465 }
 0x6ab   :  { %3143 = vrcp.f32 %v466_v47 }
 0x6ac   :  { %3145 = vrcp.f32 %v644_v39 }
 0x6ad   :  { %3147 = vrcp.f32 %v810_v46  ;;  %v2626_v46 = vld [vmem:[%s3850_s9] ss:$0 sm:$0xff] }
 0x6ae   :  { %v648_v51 = vpop.permute.xlu0 %647 }
 0x6b5   :  { %v3144_v48 = vpop.eup %3143 }
 0x6b6   :  { %v468_v49 = vmul.f32 %v3144_v48, %v3142_v40  ;;  %v3146_v50 = vpop.eup %3145  ;;  %v2627_v48 = vld [vmem:[%s3851_s10] ss:$0 sm:$0xff] }
 0x6b7   :  { %v646_v52 = vmul.f32 %v3146_v50, %v3138_v30  ;;  %v3148_v53 = vpop.eup %3147  ;;  %v3015_v30 = vpack.c.bf16 %v1029_v29, %v1028_v28 }
 0x6b8   :  { %2801 = vmatmul.mubr.msk.f32.vlgmr.msra.gmra.mrb[8].mxu1 %vm291_vm7, %v468_v49  ;;  %v812_v54 = vmul.f32 %v3148_v53, %v3140_v42 }
 0x6b9   :  { %2809 = vmatpush3.msra.mxu1 %v648_v51  ;;  %2810 = vmatprep.mubr.msk.f32.mxu1 %vm3224_vm1, %v3223_v36 }
 0x6ba   :  { %2818 = vmatprep.subr.mxu1 %v3223_v36 }
 0x6bc   :  { %2811 = vmatmul.mubr.msk.f32.vlgmr.msra.gmra.mrb[10].mxu1 %vm291_vm7, %v646_v52 }
 0x6bd   :  { %2819 = vmatpush3.msra.mxu1 %v814_v41  ;;  %2820 = vmatprep.mubr.msk.f32.mxu1 %vm3224_vm1, %v3223_v36 }
 0x6be   :  { %3016 = vmatprep.subr.bf16.mxu1 %v3015_v30 }
 0x6c0   :  { %2821 = vmatmul.mubr.msk.f32.vlgmr.msra.gmra.mrb[12].mxu1 %vm291_vm7, %v812_v54  ;;  %v1138_v54 = vld [vmem:[%s3854_s13 + $0x10] sm:$0xff] }
 0x6c1   :  { %3018 = vmatpush3.bf16.msra.mxu1 %v3015_v30  ;;  %v3027_v57 = vpack.c.bf16 %v1139_v55, %v1138_v54 }
 0x6c2   :  { %3020 = vmatprep.subr.bf16.mxu1 %v3019_v33 }
 0x6c5   :  { %3022 = vmatpush3.bf16.msra.mxu1 %v3019_v33 }
 0x78b   :  { %v541_v63 = vpop.f32.mrb[8].mxu1 }
 0x78c   :  { %546 = vrot.lane.b32.xlu1 %v541_v63, %s3864_s3  ;;  %v2802_v2 = vpop.f32.mrb[9].mxu1  ;;  %v1143_v63 = vld [vmem:[%s3854_s13 + $0x38] sm:$0xff] }
 0x78d   :  { %v3035_v2 = vpack.c.bf16 %v1143_v63, %v1142_v61  ;;  %v1279_v61 = vld [vmem:[%s3846_s5 + $0x38] sm:$0xff] }
 0x78f   :  { %v719_v3 = vpop.f32.mrb[10].mxu1 }
 0x790   :  { %v2812_v4 = vpop.f32.mrb[11].mxu1 }
 0x791   :  { %v1145_v4 = vld [vmem:[%s3854_s13 + $0x48] sm:$0xff] }
 0x793   :  { %v885_v5 = vpop.f32.mrb[12].mxu1 }
 0x794   :  { %890 = vrot.lane.b32.xlu1 %v885_v5, %s3864_s3  ;;  %v2822_v6 = vpop.f32.mrb[13].mxu1 }
 0x795   :  { %v1146_v6 = vld [vmem:[%s3854_s13 + $0x50] sm:$0xff] }
 0x7fe   :  { %v547_v7 = vpop.permute.xlu1 %546 }
 0x7ff   :  { %v549_v8 = vsel %vm214_vm2, %v3440_v24, %v547_v7  ;;  %v1147_v7 = vld [vmem:[%s3854_s13 + $0x58] sm:$0xff] }
 0x800   :  { %2831 = vmatprep.mubr.msk.f32.mxu0 %vm72_vm0, %v549_v8  ;;  %v3043_v8 = vpack.c.bf16 %v1147_v7, %v1146_v6 }
 0x806   :  { %v891_v9 = vpop.permute.xlu1 %890 }
 0x807   :  { %v893_v10 = vsel %vm214_vm2, %v719_v3, %v891_v9  ;;  %v1144_v3 = vld [vmem:[%s3854_s13 + $0x40] sm:$0xff] }
 0x808   :  { %2832 = vmatmul.mubr.msk.f32.vlgmr.msra.gmra.mrb[4].mxu0 %vm72_vm0, %v893_v10  ;;  %v3039_v5 = vpack.c.bf16 %v1145_v4, %v1144_v3  ;;  %v1148_v9 = vld [vmem:[%s3854_s13 + $0x60] sm:$0xff]  ;;  %v1149_v10 = vld [vmem:[%s3854_s13 + $0x68] sm:$0xff] }
 0x809   :  { %3026 = vmatpush3.bf16.msra.mxu0 %v3023_v37 }
 0x80a   :  { %3028 = vmatprep.subr.bf16.mxu0 %v3027_v57 }
 0x80d   :  { %3030 = vmatpush3.bf16.msra.mxu0 %v3027_v57  ;;  %v1276_v57 = vld [vmem:[%s3846_s5 + $0x20] sm:$0xff] }
 0x80e   :  { %3032 = vmatprep.subr.bf16.mxu0 %v3031_v60  ;;  %v3055_v59 = vpack.c.bf16 %v1277_v58, %v1276_v57 }
 0x810   :  { %3056 = vmatprep.subr.bf16.mxu1 %v3055_v59 }
 0x811   :  { %3034 = vmatpush3.bf16.msra.mxu0 %v3031_v60  ;;  %v1278_v60 = vld [vmem:[%s3846_s5 + $0x30] sm:$0xff] }
 0x812   :  { %3036 = vmatprep.subr.bf16.mxu0 %v3035_v2  ;;  %v3059_v63 = vpack.c.bf16 %v1279_v61, %v1278_v60 }
 0x815   :  { %3038 = vmatpush3.bf16.msra.mxu0 %v3035_v2 }
 0x816   :  { %3040 = vmatprep.subr.bf16.mxu0 %v3039_v5 }
 0x819   :  { %3042 = vmatpush3.bf16.msra.mxu0 %v3039_v5 }
 0x81a   :  { %3044 = vmatprep.subr.bf16.mxu0 %v3043_v8 }
 0x81d   :  { %3046 = vmatpush3.bf16.msra.mxu0 %v3043_v8 }
 0x8db   :  { %v2833_v12 = vpop.f32.mrb[4].mxu0 }
 0x8dc   :  { %v981_v13 = vadd.f32 %v2833_v12, %v3341_v1  ;;  %v971_v14 = vpop.f32.mrb[5].mxu0  ;;  %v1150_v12 = vld [vmem:[%s3854_s13 + $0x70] sm:$0xff] }
 0x8dd   :  { %v980_v15 = vadd.f32 %v971_v14, %v3336_v0 }
 0x8de   :  { %v3487_v16 = vadd.f32 %v2625_v11, %v981_v13  ;;  %v1151_v13 = vld [vmem:[%s3854_s13 + $0x78] sm:$0xff] }
 0x8df   :  { %v3489_v17 = vadd.f32 %v2625_v11, %v980_v15  ;;  %v3047_v11 = vpack.c.bf16 %v1149_v10, %v1148_v9  ;;  %v3051_v14 = vpack.c.bf16 %v1151_v13, %v1150_v12  ;;  %v2628_v15 = vld [vmem:[%s3853_s12] ss:$0 sm:$0xff]  ;;  %v2632_v9 = vld [vmem:[%s3873_s0 + $0x1] ss:$0 sm:$0xff] }
 0x8e0   :  { %v993_v18 = vsel %vm72_vm0, %v3487_v16, 0.0  ;;  %v2633_v13 = vld [vmem:[%s3845_s4 + $0x1] ss:$0 sm:$0xff]  ;;  %s3879_s4 = smov 48  }
 0x8e1   :  { %994 = vadd.xlane.f32.xlu1 %v993_v18  ;;  %v990_v19 = vsel %vm72_vm0, %v3489_v17, 0.0  ;;  %3048 = vmatprep.subr.bf16.mxu0 %v3047_v11 }
 0x8e2   :  { %991 = vadd.xlane.f32.xlu0 %v990_v19  ;;  %3050 = vmatpush3.bf16.msra.mxu0 %v3047_v11 }
 0x8e3   :  { %3052 = vmatprep.subr.bf16.mxu0 %v3051_v14 }
 0x8e6   :  { %3054 = vmatpush3.bf16.msra.mxu0 %v3051_v14 }
 0x8e7   :  { %2921 = vmatprep.subr.mxu0 %v3223_v36 }
 0x96e   :  { %v995_v20 = vpop.xlane.xlu1 %994 }
 0x96f   :  { %v997_v21 = vmul.f32 0.03125, %v995_v20  ;;  %v992_v22 = vpop.xlane.xlu0 %991 }
 0x970   :  { %v996_v23 = vmul.f32 0.03125, %v992_v22 }
 0x971   :  { %v999_v1 = vsub.f32 %v3487_v16, %v997_v21 }
 0x972   :  { %v998_v0 = vsub.f32 %v3489_v17, %v996_v23 }
 0x973   :  { %v1001_v26 = vmul.f32 %v999_v1, %v999_v1 }
 0x974   :  { %v1000_v24 = vmul.f32 %v998_v0, %v998_v0 }
 0x975   :  { %v1005_v27 = vsel %vm72_vm0, %v1001_v26, 0.0 }
 0x976   :  { %v1002_v25 = vsel %vm72_vm0, %v1000_v24, 0.0 }
 0x977   :  { %1003 = vadd.xlane.f32.xlu0 %v1002_v25 }
 0x97b   :  { %1006 = vadd.xlane.f32.xlu0 %v1005_v27 }
 0xa04   :  { %v1004_v38 = vpop.xlane.xlu0 %1003 }
 0xa05   :  { %v1008_v39 = vmul.f32 0.03125, %v1004_v38 }
 0xa07   :  { %v1010_v42 = vadd.f32 1e-05, %v1008_v39  ;;  %v2631_v39 = vld [vmem:[%s3855_s14] ss:$0 sm:$0xff] }
 0xa08   :  { %v1007_v43 = vpop.xlane.xlu0 %1006 }
 0xa09   :  { %3149 = vrsqrt.f32 %v1010_v42  ;;  %v1009_v44 = vmul.f32 0.03125, %v1007_v43 }
 0xa0b   :  { %v1011_v40 = vadd.f32 1e-05, %v1009_v44 }
 0xa0d   :  { %3151 = vrsqrt.f32 %v1011_v40 }
 0xa13   :  { %v3150_v45 = vpop.eup %3149 }
 0xa14   :  { %v1014_v47 = vmul.f32 %v3150_v45, %v998_v0 }
 0xa16   :  { %v1020_v49 = vmul.f32 %v2626_v46, %v1014_v47 }
 0xa17   :  { %v3152_v50 = vpop.eup %3151 }
 0xa18   :  { %v1015_v51 = vmul.f32 %v3152_v50, %v999_v1  ;;  %v1026_v52 = vadd.f32 %v2627_v48, %v1020_v49 }
 0xa1a   :  { %v1021_v53 = vmul.f32 %v2626_v46, %v1015_v51  ;;  %2842 = vmatprep.mubr.msk.f32.mxu1 %vm72_vm0, %v1026_v52 }
 0xa1c   :  { %v1027_v41 = vadd.f32 %v2627_v48, %v1021_v53 }
 0xa1e   :  { %2843 = vmatmul.mubr.msk.f32.vlgmr.msra.gmra.mrb[14].mxu1 %vm72_vm0, %v1027_v41 }
 0xa1f   :  { %3058 = vmatpush3.bf16.msra.mxu1 %v3055_v59 }
 0xa20   :  { %3060 = vmatprep.subr.bf16.mxu1 %v3059_v63 }
 0xa23   :  { %3062 = vmatpush3.bf16.msra.mxu1 %v3059_v63 }
 0xa24   :  { %2891 = vmatprep.subr.mxu1 %v3223_v36 }
 0xaf1   :  { %v2844_v18 = vpop.f32.mrb[14].mxu1 }
 0xaf2   :  { %v1115_v19 = vadd.f32 %v2844_v18, %v2628_v15  ;;  %v1109_v20 = vpop.f32.mrb[15].mxu1 }
 0xaf3   :  { %v1110_v21 = vadd.f32 %v2628_v15, %v1109_v20  ;;  %v2634_v20 = vld [vmem:[%s3847_s6 + $0x1] ss:$0 sm:$0xff]  ;;  %s3880_s6 = smov 16  }
 0xaf4   :  { %v1121_v22 = vmul.f32 0.044715, %v1115_v19  ;;  %v1119_v35 = vmul.f32 0.5, %v1115_v19 }
 0xaf5   :  { %v1120_v23 = vmul.f32 0.044715, %v1110_v21  ;;  %v1118_v33 = vmul.f32 0.5, %v1110_v21 }
 0xaf6   :  { %v1123_v1 = vmul.f32 %v1121_v22, %v1115_v19 }
 0xaf7   :  { %v1122_v0 = vmul.f32 %v1120_v23, %v1110_v21 }
 0xaf8   :  { %v1125_v24 = vmul.f32 %v1123_v1, %v1115_v19 }
 0xaf9   :  { %v1124_v25 = vmul.f32 %v1122_v0, %v1110_v21 }
 0xafa   :  { %v1127_v26 = vadd.f32 %v1125_v24, %v1115_v19 }
 0xafb   :  { %v1126_v27 = vadd.f32 %v1124_v25, %v1110_v21 }
 0xafc   :  { %v1129_v28 = vmul.f32 0.7978846, %v1127_v26 }
 0xafd   :  { %v1128_v29 = vmul.f32 0.7978846, %v1126_v27 }
 0xafe   :  { %3153 = vtanh.f32 %v1129_v28 }
 0xaff   :  { %3155 = vtanh.f32 %v1128_v29 }
 0xb08   :  { %v3154_v30 = vpop.eup %3153 }
 0xb09   :  { %v3156_v31 = vpop.eup %3155  ;;  %v1133_v32 = vadd.f32 1.0, %v3154_v30 }
 0xb0a   :  { %v1132_v34 = vadd.f32 1.0, %v3156_v31 }
 0xb0b   :  { %v1135_v38 = vmul.f32 %v1133_v32, %v1119_v35 }
 0xb0c   :  { %v1134_v37 = vmul.f32 %v1132_v34, %v1118_v33 }
 0xb0e   :  { %2877 = vmatprep.mubr.f32.mxu0 %v1134_v37 }
 0xb0f   :  { %2878 = vmatmul.mubr.f32.vlgmr.msra.gmra.mrb[6].mxu0 %v1135_v38 }
 0xb10   :  { %2923 = vmatprep.mubr.msk.f32.mxu0 %vm3224_vm1, %v3223_v36 }
 0xbe2   :  { %v2879_v42 = vpop.f32.mrb[6].mxu0 }
 0xbe3   :  { %v1229_v43 = vadd.f32 %v2879_v42, %v3487_v16  ;;  %v1219_v44 = vpop.f32.mrb[7].mxu0 }
 0xbe4   :  { %v1228_v40 = vadd.f32 %v1219_v44, %v3489_v17 }
 0xbe5   :  { %v3578_v45 = vadd.f32 %v2631_v39, %v1229_v43 }
 0xbe6   :  { %v3580_v46 = vadd.f32 %v2631_v39, %v1228_v40 }
 0xbe7   :  { %v1241_v47 = vsel %vm72_vm0, %v3578_v45, 0.0 }
 0xbe8   :  { %1242 = vadd.xlane.f32.xlu1 %v1241_v47  ;;  %v1238_v48 = vsel %vm72_vm0, %v3580_v46, 0.0 }
 0xbe9   :  { %1239 = vadd.xlane.f32.xlu0 %v1238_v48 }
 0xc75   :  { %v1243_v49 = vpop.xlane.xlu1 %1242 }
 0xc76   :  { %v1245_v50 = vmul.f32 0.03125, %v1243_v49  ;;  %v1240_v51 = vpop.xlane.xlu0 %1239 }
 0xc77   :  { %v1244_v52 = vmul.f32 0.03125, %v1240_v51 }
 0xc78   :  { %v1247_v16 = vsub.f32 %v3578_v45, %v1245_v50 }
 0xc79   :  { %v1246_v17 = vsub.f32 %v3580_v46, %v1244_v52 }
 0xc7a   :  { %v1249_v53 = vmul.f32 %v1247_v16, %v1247_v16 }
 0xc7b   :  { %v1248_v41 = vmul.f32 %v1246_v17, %v1246_v17 }
 0xc7c   :  { %v1253_v54 = vsel %vm72_vm0, %v1249_v53, 0.0 }
 0xc7d   :  { %1254 = vadd.xlane.f32.xlu1 %v1253_v54  ;;  %v1250_v55 = vsel %vm72_vm0, %v1248_v41, 0.0 }
 0xc7e   :  { %1251 = vadd.xlane.f32.xlu0 %v1250_v55 }
 0xd0a   :  { %v1255_v2 = vpop.xlane.xlu1 %1254 }
 0xd0b   :  { %v1257_v3 = vmul.f32 0.03125, %v1255_v2  ;;  %v1252_v4 = vpop.xlane.xlu0 %1251 }
 0xd0c   :  { %v1256_v5 = vmul.f32 0.03125, %v1252_v4 }
 0xd0d   :  { %v1259_v6 = vadd.f32 1e-05, %v1257_v3 }
 0xd0e   :  { %v1258_v7 = vadd.f32 1e-05, %v1256_v5 }
 0xd0f   :  { %3157 = vrsqrt.f32 %v1259_v6 }
 0xd10   :  { %3159 = vrsqrt.f32 %v1258_v7 }
 0xd19   :  { %v3158_v8 = vpop.eup %3157 }
 0xd1a   :  { %v3160_v10 = vpop.eup %3159  ;;  %v1263_v11 = vmul.f32 %v3158_v8, %v1247_v16 }
 0xd1b   :  { %v1262_v12 = vmul.f32 %v3160_v10, %v1246_v17 }
 0xd1c   :  { %v1269_v14 = vmul.f32 %v2632_v9, %v1263_v11 }
 0xd1d   :  { %v1268_v15 = vmul.f32 %v2632_v9, %v1262_v12 }
 0xd1e   :  { %v1275_v19 = vadd.f32 %v2633_v13, %v1269_v14 }
 0xd1f   :  { %v1274_v18 = vadd.f32 %v2633_v13, %v1268_v15 }
 0xd21   :  { %2888 = vmatprep.mubr.msk.f32.mxu1 %vm72_vm0, %v1274_v18 }
 0xd22   :  { %2889 = vmatmul.mubr.msk.f32.vlgmr.msra.gmra.mrb[16].mxu1 %vm72_vm0, %v1275_v19 }
 0xd23   :  { %2893 = vmatprep.mubr.msk.f32.mxu1 %vm3224_vm1, %v3223_v36 }
 0xdf5   :  { %v2890_v21 = vpop.f32.mrb[16].mxu1 }
 0xdf6   :  { %v3616_v22 = vadd.f32 %v2890_v21, %v2634_v20  ;;  %v1357_v23 = vpop.f32.mrb[17].mxu1 }
 0xdf7   :  { %v1358_v1 = vadd.f32 %v2634_v20, %v1357_v23 }
 0xdf8   :  { %v1704_v41 = vmul.f32 0.25, %v3616_v22 }
 0xdf9   :  { %1368 = vrot.lane.b32.xlu0 %v1358_v1, %s3225_s22  ;;  %v1366_v24 = vmul.f32 0.25, %v1358_v1 }
 0xdfd   :  { %1535 = vrot.lane.b32.xlu0 %v1358_v1, %s3226_s2 }
 0xe6b   :  { %v1369_v0 = vpop.permute.xlu0 %1368 }
 0xe6c   :  { %2892 = vmatpush3.xpose.msk.msra.mxu1 %vm214_vm2, %v1369_v0 }
 0xe6d   :  { %2896 = vmatprep.subr.mxu1 %v3223_v36 }
 0xe6f   :  { %2894 = vmatmul.mubr.msk.f32.vlgmr.msra.gmra.mrb[18].mxu1 %vm214_vm2, %v1366_v24  ;;  %v1536_v39 = vpop.permute.xlu0 %1535 }
 0xe70   :  { %2898 = vmatprep.mubr.msk.f32.mxu1 %vm3224_vm1, %v3223_v36 }
 0xf42   :  { %v1441_v25 = vpop.f32.mrb[18].mxu1 }
 0xf43   :  { %v1445_v26 = vsel %vm3406_vm6, %v1441_v25, -1e+09  ;;  %v2895_v27 = vpop.f32.mrb[19].mxu1 }
 0xf44   :  { %v1446_v28 = vsel %vm291_vm7, %v1445_v26, -inf }
 0xf45   :  { %1447 = vmax.xlane.f32.xlu1 %v1446_v28 }
 0xf56   :  { %1457 = vrot.lane.b32.xlu1 %v1358_v1, %s3229_s26 }
 0xfd2   :  { %v1448_v29 = vpop.xlane.xlu1 %1447 }
 0xfd3   :  { %v1449_v30 = vsub.f32 %v1445_v26, %v1448_v29  ;;  %v2043_v29 = vld [vmem:[%s3848_s7 + $0x28] sm:$0xff] }
 0xfd5   :  { %v1450_v31 = vmul.f32 1.442695, %v1449_v30  ;;  %v2044_v30 = vld [vmem:[%s3848_s7 + $0x30] sm:$0xff] }
 0xfd6   :  { %v1458_v32 = vpop.permute.xlu1 %1457 }
 0xfd7   :  { %3161 = vpow2.f32 %v1450_v31  ;;  %2897 = vmatpush3.msra.mxu1 %v1458_v32 }
 0xfd8   :  { %2901 = vmatprep.subr.mxu1 %v3223_v36 }
 0xfe1   :  { %v3162_v33 = vpop.eup %3161 }
 0xfe2   :  { %v1452_v34 = vsel %vm291_vm7, %v3162_v33, 0.0 }
 0xfe3   :  { %1453 = vadd.xlane.f32.xlu1 %v1452_v34 }
 0xff4   :  { %1533 = vrot.lane.b32.xlu1 %v1366_v24, %s3227_s23 }
 0xff8   :  { %1706 = vrot.lane.b32.xlu1 %v3616_v22, %s3225_s22 }
0x1070   :  { %v1454_v35 = vpop.xlane.xlu1 %1453 }
0x1071   :  { %3163 = vrcp.f32 %v1454_v35 }
0x1074   :  { %v1534_v42 = vpop.permute.xlu1 %1533 }
0x1078   :  { %v1707_v54 = vpop.permute.xlu1 %1706 }
0x107b   :  { %v3164_v37 = vpop.eup %3163 }
0x107c   :  { %v1456_v38 = vmul.f32 %v3164_v37, %v3162_v33 }
0x107e   :  { %2899 = vmatmul.mubr.msk.f32.vlgmr.msra.gmra.mrb[20].mxu1 %vm291_vm7, %v1456_v38 }
0x107f   :  { %2902 = vmatpush3.xpose.msk.msra.mxu1 %vm214_vm2, %v1536_v39  ;;  %2903 = vmatprep.mubr.msk.f32.mxu1 %vm3224_vm1, %v3223_v36 }
0x1080   :  { %2906 = vmatprep.subr.mxu1 %v3223_v36 }
0x1082   :  { %2904 = vmatmul.mubr.msk.f32.vlgmr.msra.gmra.mrb[22].mxu1 %vm214_vm2, %v1534_v42  ;;  %v2651_v42 = vld [vmem:[%s3849_s8 + $0x1] ss:$0 sm:$0xff] }
0x1083   :  { %2908 = vmatprep.mubr.msk.f32.mxu1 %vm3224_vm1, %v3223_v36 }
0x1151   :  { %v1529_v43 = vpop.f32.mrb[20].mxu1 }
0x1152   :  { %v2900_v44 = vpop.f32.mrb[21].mxu1 }
0x1155   :  { %v1607_v40 = vpop.f32.mrb[22].mxu1 }
0x1156   :  { %v1611_v47 = vsel %vm3406_vm6, %v1607_v40, -1e+09  ;;  %v2905_v48 = vpop.f32.mrb[23].mxu1 }
0x1157   :  { %v1612_v49 = vsel %vm291_vm7, %v1611_v47, -inf }
0x1158   :  { %1613 = vmax.xlane.f32.xlu0 %v1612_v49 }
0x116e   :  { %1623 = vrot.lane.b32.xlu0 %v1358_v1, %s3879_s4 }
0x1172   :  { %1873 = vrot.lane.b32.xlu0 %v3616_v22, %s3226_s2 }
0x11e5   :  { %v1614_v50 = vpop.xlane.xlu0 %1613 }
0x11e6   :  { %v1615_v51 = vsub.f32 %v1611_v47, %v1614_v50 }
0x11e8   :  { %v1616_v52 = vmul.f32 1.442695, %v1615_v51 }
0x11e9   :  { %v1624_v16 = vpop.permute.xlu0 %1623 }
0x11ea   :  { %3165 = vpow2.f32 %v1616_v52  ;;  %2907 = vmatpush3.msra.mxu1 %v1624_v16 }
0x11eb   :  { %2911 = vmatprep.subr.mxu1 %v3223_v36 }
0x11ed   :  { %v1874_v17 = vpop.permute.xlu0 %1873 }
0x11ee   :  { %2922 = vmatpush3.xpose.msk.msra.mxu0 %vm214_vm2, %v1874_v17 }
0x11f4   :  { %v3166_v56 = vpop.eup %3165 }
0x11f5   :  { %v1618_v53 = vsel %vm291_vm7, %v3166_v56, 0.0 }
0x11f6   :  { %1619 = vadd.xlane.f32.xlu1 %v1618_v53 }
0x1207   :  { %1871 = vrot.lane.b32.xlu1 %v1704_v41, %s3227_s23 }
0x1283   :  { %v1620_v55 = vpop.xlane.xlu1 %1619 }
0x1284   :  { %3167 = vrcp.f32 %v1620_v55 }
0x1287   :  { %v1872_v57 = vpop.permute.xlu1 %1871 }
0x1288   :  { %2924 = vmatmul.mubr.msk.f32.vlgmr.msra.gmra.mrb[8].mxu0 %vm214_vm2, %v1872_v57  ;;  %v2176_v57 = vld [vmem:[%s3852_s11 + $0x20] sm:$0xff] }
0x128e   :  { %v3168_v58 = vpop.eup %3167 }
0x128f   :  { %v1622_v59 = vmul.f32 %v3168_v58, %v3166_v56  ;;  %v2177_v58 = vld [vmem:[%s3852_s11 + $0x28] sm:$0xff] }
0x1291   :  { %2909 = vmatmul.mubr.msk.f32.vlgmr.msra.gmra.mrb[24].mxu1 %vm291_vm7, %v1622_v59  ;;  %v3071_v59 = vpack.c.bf16 %v2177_v58, %v2176_v57 }
0x1292   :  { %2912 = vmatpush3.xpose.msk.msra.mxu1 %vm214_vm2, %v1707_v54  ;;  %2913 = vmatprep.mubr.msk.f32.mxu1 %vm3224_vm1, %v3223_v36 }
0x1293   :  { %2916 = vmatprep.subr.mxu1 %v3223_v36 }
0x1295   :  { %2914 = vmatmul.mubr.msk.f32.vlgmr.msra.gmra.mrb[26].mxu1 %vm214_vm2, %v1704_v41 }
0x1296   :  { %2918 = vmatprep.mubr.msk.f32.mxu1 %vm3224_vm1, %v3223_v36 }
0x135b   :  { %v1945_v60 = vpop.f32.mrb[8].mxu0 }
0x135c   :  { %v1949_v61 = vsel %vm3413_vm9, %v1945_v60, -1e+09  ;;  %v2925_v63 = vpop.f32.mrb[9].mxu0  ;;  %v2178_v60 = vld [vmem:[%s3852_s11 + $0x30] sm:$0xff] }
0x135d   :  { %v1950_v2 = vsel %vm291_vm7, %v1949_v61, -inf }
0x135e   :  { %1951 = vmax.xlane.f32.xlu1 %v1950_v2  ;;  %v2284_v2 = vld [vmem:[%s3854_s13 + $0x80] sm:$0xff] }
0x1364   :  { %v1695_v3 = vpop.f32.mrb[24].mxu1 }
0x1365   :  { %v2910_v4 = vpop.f32.mrb[25].mxu1 }
0x1368   :  { %v1779_v5 = vpop.f32.mrb[26].mxu1 }
0x1369   :  { %v1783_v6 = vsel %vm3413_vm9, %v1779_v5, -1e+09  ;;  %v2915_v7 = vpop.f32.mrb[27].mxu1 }
0x136a   :  { %v1784_v8 = vsel %vm291_vm7, %v1783_v6, -inf }
0x136b   :  { %1785 = vmax.xlane.f32.xlu0 %v1784_v8 }
0x136f   :  { %1961 = vrot.lane.b32.xlu1 %v3616_v22, %s3879_s4 }
0x1373   :  { %1700 = vrot.lane.b32.xlu1 %v1695_v3, %s3880_s6  ;;  %v2285_v3 = vld [vmem:[%s3854_s13 + $0x88] sm:$0xff] }
0x1374   :  { %v3079_v4 = vpack.c.bf16 %v2285_v3, %v2284_v2 }
0x13eb   :  { %v1952_v9 = vpop.xlane.xlu1 %1951 }
0x13ec   :  { %v1953_v10 = vsub.f32 %v1949_v61, %v1952_v9  ;;  %v2179_v61 = vld [vmem:[%s3852_s11 + $0x38] sm:$0xff]  ;;  %s3881_s11 = sld [smem:[#allocation7_spill]] }
0x13ed   :  { %v3075_v63 = vpack.c.bf16 %v2179_v61, %v2178_v60 }
0x13ee   :  { %v1954_v11 = vmul.f32 1.442695, %v1953_v10 }
0x13ef   :  { %v1962_v12 = vpop.permute.xlu1 %1961 }
0x13f0   :  { %3169 = vpow2.f32 %v1954_v11 }
0x13f3   :  { %v1701_v13 = vpop.permute.xlu1 %1700 }
0x13f4   :  { %v1703_v14 = vsel %vm214_vm2, %v1529_v43, %v1701_v13 }
0x13f5   :  { %2939 = vmatprep.mubr.msk.f32.mxu0 %vm72_vm0, %v1703_v14  ;;  %v2653_v14 = vld [vmem:[%s3851_s10 + $0x1] ss:$0 sm:$0xff] }
0x13f8   :  { %v1786_v62 = vpop.xlane.xlu0 %1785 }
0x13f9   :  { %v1787_v15 = vsub.f32 %v1783_v6, %v1786_v62 }
0x13fa   :  { %v3170_v18 = vpop.eup %3169 }
0x13fb   :  { %v1788_v19 = vmul.f32 1.442695, %v1787_v15  ;;  %v1956_v20 = vsel %vm291_vm7, %v3170_v18, 0.0 }
0x13fc   :  { %1957 = vadd.xlane.f32.xlu0 %v1956_v20 }
0x13fd   :  { %3171 = vpow2.f32 %v1788_v19 }
0x1407   :  { %v3172_v21 = vpop.eup %3171 }
0x1408   :  { %v1790_v23 = vsel %vm291_vm7, %v3172_v21, 0.0 }
0x1409   :  { %1791 = vadd.xlane.f32.xlu0 %v1790_v23  ;;  %v2286_v23 = vld [vmem:[%s3854_s13 + $0x90] sm:$0xff] }
0x141f   :  { %1795 = vrot.lane.b32.xlu0 %v3616_v22, %s3229_s26  ;;  %v2042_v22 = vld [vmem:[%s3848_s7 + $0x20] sm:$0xff]  ;;  %s3232_s26 = smov [#allocation2]  }
0x1420   :  { %v3063_v31 = vpack.c.bf16 %v2043_v29, %v2042_v22  ;;  %v2292_v29 = vld [vmem:[%s3854_s13 + $0xc0] sm:$0xff]  ;;  %s2594_s24 = sshll.u32 %s3232_s26, 4  ;;  %s2595_s24 = int_to_ptr.vmem [resolvable:$true] %s2594_s24 }
0x1421   :  { %s3199_s25 = scalar_lea.vmem %s2595_s24, 16  ;;  %s3203_s28 = scalar_lea.vmem %s2595_s24, 32 }
0x1422   :  { %3064 = vmatprep.subr.bf16.mxu0 %v3063_v31  ;;  %p3200_p0 = scmp.ne.s32.totalorder %s2595_s24, %s3199_s25  ;;  %p3204_p1 = scmp.lt.s32.totalorder %s2595_s24, %s2595_s24 }
0x1423   :  { %3066 = vmatpush3.bf16.msra.mxu0 %v3063_v31  ;;  %p3205_p2 = scmp.lt.s32.totalorder %s3203_s28, %s3199_s25 }
0x1425   :  { %p3206_p3 = por %p3205_p2, %p3204_p1 }
0x1427   :  { %p3207_p4 = pnand %p3206_p3, %p3200_p0 }
0x1489   :  { %v1958_v1 = vpop.xlane.xlu0 %1957 }
0x1496   :  { %v1792_v0 = vpop.xlane.xlu0 %1791 }
0x1497   :  { %3173 = vrcp.f32 %v1792_v0 }
0x1498   :  { %3175 = vrcp.f32 %v1958_v1  ;;  %v2287_v1 = vld [vmem:[%s3854_s13 + $0x98] sm:$0xff] }
0x1499   :  { %v3083_v0 = vpack.c.bf16 %v2287_v1, %v2286_v23  ;;  %v2429_v23 = vld [vmem:[%s3858_s17 + $0x8] sm:$0xff] }
0x149a   :  { %v1796_v24 = vpop.permute.xlu0 %1795 }
0x149b   :  { %2917 = vmatpush3.msra.mxu1 %v1796_v24  ;;  %v2288_v24 = vld [vmem:[%s3854_s13 + $0xa0] sm:$0xff] }
0x149c   :  { %2926 = vmatprep.subr.mxu1 %v3223_v36 }
0x14a1   :  { %v3174_v25 = vpop.eup %3173 }
0x14a2   :  { %v1794_v26 = vmul.f32 %v3174_v25, %v3172_v21  ;;  %v3176_v27 = vpop.eup %3175  ;;  %v2289_v25 = vld [vmem:[%s3854_s13 + $0xa8] sm:$0xff] }
0x14a3   :  { %v1960_v28 = vmul.f32 %v3176_v27, %v3170_v18  ;;  %v2290_v27 = vld [vmem:[%s3854_s13 + $0xb0] sm:$0xff] }
0x14a4   :  { %2919 = vmatmul.mubr.msk.f32.vlgmr.msra.gmra.mrb[28].mxu1 %vm291_vm7, %v1794_v26  ;;  %v3087_v26 = vpack.c.bf16 %v2289_v25, %v2288_v24  ;;  %v2431_v24 = vld [vmem:[%s3858_s17 + $0x18] sm:$0xff] }
0x14a5   :  { %2927 = vmatpush3.msra.mxu1 %v1962_v12  ;;  %2928 = vmatprep.mubr.msk.f32.mxu1 %vm3224_vm1, %v3223_v36  ;;  %v2045_v36 = vld [vmem:[%s3848_s7 + $0x38] sm:$0xff]  ;;  %v2652_v12 = vld [vmem:[%s3850_s9 + $0x1] ss:$0 sm:$0xff] }
0x14a6   :  { %v3067_v32 = vpack.c.bf16 %v2045_v36, %v2044_v30  ;;  %3072 = vmatprep.subr.bf16.mxu1 %v3071_v59  ;;  %v2293_v30 = vld [vmem:[%s3854_s13 + $0xc8] sm:$0xff]  ;;  %v2294_v36 = vld [vmem:[%s3854_s13 + $0xd0] sm:$0xff] }
0x14a7   :  { %v3095_v31 = vpack.c.bf16 %v2293_v30, %v2292_v29 }
0x14a8   :  { %2929 = vmatmul.mubr.msk.f32.vlgmr.msra.gmra.mrb[30].mxu1 %vm291_vm7, %v1960_v28  ;;  %3068 = vmatprep.subr.bf16.mxu0 %v3067_v32  ;;  %v2291_v28 = vld [vmem:[%s3854_s13 + $0xb8] sm:$0xff] }
0x14a9   :  { %3070 = vmatpush3.bf16.msra.mxu0 %v3067_v32  ;;  %3074 = vmatpush3.bf16.msra.mxu1 %v3071_v59  ;;  %v3091_v22 = vpack.c.bf16 %v2291_v28, %v2290_v27  ;;  %v2295_v32 = vld [vmem:[%s3854_s13 + $0xd8] sm:$0xff] }
0x14aa   :  { %3076 = vmatprep.subr.bf16.mxu1 %v3075_v63  ;;  %3080 = vmatprep.subr.bf16.mxu0 %v3079_v4 }
0x14ad   :  { %3078 = vmatpush3.bf16.msra.mxu1 %v3075_v63 }
0x1577   :  { %v1867_v33 = vpop.f32.mrb[28].mxu1 }
0x1578   :  { %v2920_v34 = vpop.f32.mrb[29].mxu1 }
0x1579   :  { %v2296_v34 = vld [vmem:[%s3854_s13 + $0xe0] sm:$0xff] }
0x157b   :  { %v2033_v35 = vpop.f32.mrb[30].mxu1 }
0x157c   :  { %2038 = vrot.lane.b32.xlu1 %v2033_v35, %s3880_s6  ;;  %v2930_v37 = vpop.f32.mrb[31].mxu1  ;;  %v2297_v35 = vld [vmem:[%s3854_s13 + $0xe8] sm:$0xff] }
0x157d   :  { %v3103_v37 = vpack.c.bf16 %v2297_v35, %v2296_v34  ;;  %v2659_v35 = vld [vmem:[%s3857_s16] ss:$0 sm:$0xff] }
0x15ee   :  { %v2039_v38 = vpop.permute.xlu1 %2038 }
0x15ef   :  { %v2041_v39 = vsel %vm214_vm2, %v1867_v33, %v2039_v38  ;;  %v3099_v33 = vpack.c.bf16 %v2295_v32, %v2294_v36  ;;  %v2298_v38 = vld [vmem:[%s3854_s13 + $0xf0] sm:$0xff]  ;;  %v2658_v36 = vld [vmem:[%s3856_s15] ss:$0 sm:$0xff] }
0x15f0   :  { %2940 = vmatmul.mubr.msk.f32.vlgmr.msra.gmra.mrb[10].mxu0 %vm72_vm0, %v2041_v39  ;;  %v2299_v39 = vld [vmem:[%s3854_s13 + $0xf8] sm:$0xff] }
0x15f1   :  { %3082 = vmatpush3.bf16.msra.mxu0 %v3079_v4  ;;  %v2657_v4 = vld [vmem:[%s3855_s14 + $0x1] ss:$0 sm:$0xff] }
0x15f2   :  { %3084 = vmatprep.subr.bf16.mxu0 %v3083_v0 }
0x15f5   :  { %3086 = vmatpush3.bf16.msra.mxu0 %v3083_v0  ;;  %v2430_v0 = vld [vmem:[%s3858_s17 + $0x10] sm:$0xff] }
0x15f6   :  { %3088 = vmatprep.subr.bf16.mxu0 %v3087_v26  ;;  %v3115_v25 = vpack.c.bf16 %v2431_v24, %v2430_v0 }
0x15f9   :  { %3090 = vmatpush3.bf16.msra.mxu0 %v3087_v26 }
0x15fa   :  { %3092 = vmatprep.subr.bf16.mxu0 %v3091_v22 }
0x15fd   :  { %3094 = vmatpush3.bf16.msra.mxu0 %v3091_v22 }
0x15fe   :  { %3096 = vmatprep.subr.bf16.mxu0 %v3095_v31 }
0x1601   :  { %3098 = vmatpush3.bf16.msra.mxu0 %v3095_v31 }
0x1602   :  { %3100 = vmatprep.subr.bf16.mxu0 %v3099_v33 }
0x1605   :  { %3102 = vmatpush3.bf16.msra.mxu0 %v3099_v33 }
0x1606   :  { %3104 = vmatprep.subr.bf16.mxu0 %v3103_v37 }
0x1609   :  { %3106 = vmatpush3.bf16.msra.mxu0 %v3103_v37 }
0x16c3   :  { %v2941_v43 = vpop.f32.mrb[10].mxu0 }
0x16c4   :  { %v2129_v44 = vadd.f32 %v2941_v43, %v3578_v45  ;;  %v2119_v40 = vpop.f32.mrb[11].mxu0  ;;  %v2654_v43 = vld [vmem:[%s3853_s12 + $0x1] ss:$0 sm:$0xff] }
0x16c5   :  { %v2128_v47 = vadd.f32 %v2119_v40, %v3580_v46 }
0x16c6   :  { %v3702_v48 = vadd.f32 %v2651_v42, %v2129_v44 }
0x16c7   :  { %v3704_v49 = vadd.f32 %v2651_v42, %v2128_v47  ;;  %v3107_v42 = vpack.c.bf16 %v2299_v39, %v2298_v38 }
0x16c8   :  { %v2141_v50 = vsel %vm72_vm0, %v3702_v48, 0.0 }
0x16c9   :  { %2142 = vadd.xlane.f32.xlu1 %v2141_v50  ;;  %v2138_v51 = vsel %vm72_vm0, %v3704_v49, 0.0  ;;  %3108 = vmatprep.subr.bf16.mxu0 %v3107_v42 }
0x16ca   :  { %2139 = vadd.xlane.f32.xlu0 %v2138_v51  ;;  %3110 = vmatpush3.bf16.msra.mxu0 %v3107_v42 }
0x1756   :  { %v2143_v52 = vpop.xlane.xlu1 %2142 }
0x1757   :  { %v2145_v16 = vmul.f32 0.03125, %v2143_v52  ;;  %v2140_v17 = vpop.xlane.xlu0 %2139 }
0x1758   :  { %v2144_v56 = vmul.f32 0.03125, %v2140_v17 }
0x1759   :  { %v2147_v45 = vsub.f32 %v3702_v48, %v2145_v16 }
0x175a   :  { %v2146_v46 = vsub.f32 %v3704_v49, %v2144_v56 }
0x175b   :  { %v2149_v54 = vmul.f32 %v2147_v45, %v2147_v45 }
0x175c   :  { %v2148_v53 = vmul.f32 %v2146_v46, %v2146_v46 }
0x175d   :  { %v2153_v55 = vsel %vm72_vm0, %v2149_v54, 0.0 }
0x175e   :  { %v2150_v41 = vsel %vm72_vm0, %v2148_v53, 0.0 }
0x175f   :  { %2151 = vadd.xlane.f32.xlu0 %v2150_v41 }
0x1763   :  { %2154 = vadd.xlane.f32.xlu0 %v2153_v55 }
0x17ec   :  { %v2152_v5 = vpop.xlane.xlu0 %2151 }
0x17ed   :  { %v2156_v6 = vmul.f32 0.03125, %v2152_v5 }
0x17ef   :  { %v2158_v7 = vadd.f32 1e-05, %v2156_v6 }
0x17f0   :  { %v2155_v8 = vpop.xlane.xlu0 %2154 }
0x17f1   :  { %3177 = vrsqrt.f32 %v2158_v7  ;;  %v2157_v9 = vmul.f32 0.03125, %v2155_v8 }
0x17f3   :  { %v2159_v10 = vadd.f32 1e-05, %v2157_v9 }
0x17f5   :  { %3179 = vrsqrt.f32 %v2159_v10 }
0x17fb   :  { %v3178_v11 = vpop.eup %3177 }
0x17fc   :  { %v2162_v13 = vmul.f32 %v3178_v11, %v2146_v46 }
0x17fe   :  { %v2168_v62 = vmul.f32 %v2652_v12, %v2162_v13 }
0x17ff   :  { %v3180_v15 = vpop.eup %3179 }
0x1800   :  { %v2163_v18 = vmul.f32 %v3180_v15, %v2147_v45  ;;  %v2174_v19 = vadd.f32 %v2653_v14, %v2168_v62 }
0x1802   :  { %v2169_v20 = vmul.f32 %v2652_v12, %v2163_v18  ;;  %2950 = vmatprep.mubr.msk.f32.mxu1 %vm72_vm0, %v2174_v19 }
0x1804   :  { %v2175_v21 = vadd.f32 %v2653_v14, %v2169_v20 }
0x1806   :  { %2951 = vmatmul.mubr.msk.f32.vlgmr.msra.gmra.mrb[32].mxu1 %vm72_vm0, %v2175_v21  ;;  %v2428_v21 = vld [vmem:[%s3858_s17] sm:$0xff] }
0x1807   :  { %v3111_v1 = vpack.c.bf16 %v2429_v23, %v2428_v21 }
0x1809   :  { %3112 = vmatprep.subr.bf16.mxu1 %v3111_v1 }
0x180a   :  { %3114 = vmatpush3.bf16.msra.mxu1 %v3111_v1 }
0x180b   :  { %3116 = vmatprep.subr.bf16.mxu1 %v3115_v25 }
0x180e   :  { %3118 = vmatpush3.bf16.msra.mxu1 %v3115_v25 }
0x18d9   :  { %v2952_v44 = vpop.f32.mrb[32].mxu1 }
0x18da   :  { %v2263_v40 = vadd.f32 %v2952_v44, %v2654_v43  ;;  %v2257_v47 = vpop.f32.mrb[33].mxu1 }
0x18db   :  { %v2258_v50 = vadd.f32 %v2654_v43, %v2257_v47 }
0x18dc   :  { %v2269_v51 = vmul.f32 0.044715, %v2263_v40  ;;  %v2267_v61 = vmul.f32 0.5, %v2263_v40 }
0x18dd   :  { %v2268_v52 = vmul.f32 0.044715, %v2258_v50  ;;  %v2266_v59 = vmul.f32 0.5, %v2258_v50 }
0x18de   :  { %v2271_v16 = vmul.f32 %v2269_v51, %v2263_v40 }
0x18df   :  { %v2270_v17 = vmul.f32 %v2268_v52, %v2258_v50 }
0x18e0   :  { %v2273_v56 = vmul.f32 %v2271_v16, %v2263_v40 }
0x18e1   :  { %v2272_v45 = vmul.f32 %v2270_v17, %v2258_v50 }
0x18e2   :  { %v2275_v46 = vadd.f32 %v2273_v56, %v2263_v40 }
0x18e3   :  { %v2274_v53 = vadd.f32 %v2272_v45, %v2258_v50 }
0x18e4   :  { %v2277_v41 = vmul.f32 0.7978846, %v2275_v46 }
0x18e5   :  { %v2276_v54 = vmul.f32 0.7978846, %v2274_v53 }
0x18e6   :  { %3181 = vtanh.f32 %v2277_v41 }
0x18e7   :  { %3183 = vtanh.f32 %v2276_v54 }
0x18f0   :  { %v3182_v55 = vpop.eup %3181 }
0x18f1   :  { %v3184_v57 = vpop.eup %3183  ;;  %v2281_v58 = vadd.f32 1.0, %v3182_v55 }
0x18f2   :  { %v2280_v60 = vadd.f32 1.0, %v3184_v57 }
0x18f3   :  { %v2283_v2 = vmul.f32 %v2281_v58, %v2267_v61  ;;  %v2550_v58 = vld [vmem:[%s3881_s11 + $0x8] sm:$0x3f] }
0x18f4   :  { %v2282_v63 = vmul.f32 %v2280_v60, %v2266_v59  ;;  %v2560_v59 = vsel %vm2528_vm10, %v2550_v58, 0.0  ;;  %v2549_v60 = vld [vmem:[%s3881_s11] sm:$0xff] }
0x18f6   :  { %2985 = vmatprep.mubr.f32.mxu0 %v2282_v63 }
0x18f7   :  { %2986 = vmatmul.mubr.f32.vlgmr.msra.gmra.mrb[12].mxu0 %v2283_v2 }
0x19ca   :  { %v2987_v3 = vpop.f32.mrb[12].mxu0 }
0x19cb   :  { %v2377_v5 = vadd.f32 %v2987_v3, %v3702_v48  ;;  %v2367_v6 = vpop.f32.mrb[13].mxu0 }
0x19cc   :  { %v2376_v7 = vadd.f32 %v2367_v6, %v3704_v49 }
0x19cd   :  { %v2383_v8 = vadd.f32 %v2657_v4, %v2377_v5 }
0x19ce   :  { %v2382_v9 = vadd.f32 %v2657_v4, %v2376_v7 }
0x19cf   :  { %v2389_v10 = vsel %vm72_vm0, %v2383_v8, 0.0 }
0x19d0   :  { %2390 = vadd.xlane.f32.xlu1 %v2389_v10  ;;  %v2386_v11 = vsel %vm72_vm0, %v2382_v9, 0.0 }
0x19d1   :  { %2387 = vadd.xlane.f32.xlu0 %v2386_v11 }
0x1a5d   :  { %v2391_v12 = vpop.xlane.xlu1 %2390 }
0x1a5e   :  { %v2393_v13 = vmul.f32 0.03125, %v2391_v12  ;;  %v2388_v14 = vpop.xlane.xlu0 %2387 }
0x1a5f   :  { %v2392_v62 = vmul.f32 0.03125, %v2388_v14 }
0x1a60   :  { %v2395_v15 = vsub.f32 %v2383_v8, %v2393_v13 }
0x1a61   :  { %v2394_v18 = vsub.f32 %v2382_v9, %v2392_v62 }
0x1a62   :  { %v2397_v19 = vmul.f32 %v2395_v15, %v2395_v15 }
0x1a63   :  { %v2396_v20 = vmul.f32 %v2394_v18, %v2394_v18 }
0x1a64   :  { %v2401_v48 = vsel %vm72_vm0, %v2397_v19, 0.0 }
0x1a65   :  { %2402 = vadd.xlane.f32.xlu1 %v2401_v48  ;;  %v2398_v49 = vsel %vm72_vm0, %v2396_v20, 0.0 }
0x1a66   :  { %2399 = vadd.xlane.f32.xlu0 %v2398_v49 }
0x1af2   :  { %v2403_v26 = vpop.xlane.xlu1 %2402 }
0x1af3   :  { %v2405_v27 = vmul.f32 0.03125, %v2403_v26  ;;  %v2400_v28 = vpop.xlane.xlu0 %2399 }
0x1af4   :  { %v2404_v22 = vmul.f32 0.03125, %v2400_v28 }
0x1af5   :  { %v2407_v29 = vadd.f32 1e-05, %v2405_v27 }
0x1af6   :  { %v2406_v30 = vadd.f32 1e-05, %v2404_v22 }
0x1af7   :  { %3185 = vrsqrt.f32 %v2407_v29 }
0x1af8   :  { %3187 = vrsqrt.f32 %v2406_v30 }
0x1b01   :  { %v3186_v31 = vpop.eup %3185 }
0x1b02   :  { %v3188_v32 = vpop.eup %3187  ;;  %v2411_v33 = vmul.f32 %v3186_v31, %v2395_v15 }
0x1b03   :  { %v2410_v34 = vmul.f32 %v3188_v32, %v2394_v18 }
0x1b04   :  { %v2419_v37 = vmul.f32 %v2658_v36, %v2411_v33 }
0x1b05   :  { %v2418_v38 = vmul.f32 %v2658_v36, %v2410_v34 }
0x1b06   :  { %v2427_v42 = vadd.f32 %v2659_v35, %v2419_v37 }
0x1b07   :  { %v2426_v39 = vadd.f32 %v2659_v35, %v2418_v38 }
0x1b09   :  { %2996 = vmatprep.mubr.msk.f32.mxu1 %vm72_vm0, %v2426_v39 }
0x1b0a   :  { %2997 = vmatmul.mubr.msk.f32.vlgmr.msra.gmra.mrb[34].mxu1 %vm72_vm0, %v2427_v42 }
0x1bdd   :  { %v2998_v43 = vpop.f32.mrb[34].mxu1 }
0x1bde   :  { %v2517_v44 = vrot.slane %v2998_v43, 6  ;;  %v2522_v40 = vrot.slane %v2998_v43, 1  ;;  %v2504_v47 = vpop.f32.mrb[35].mxu1 }
0x1bdf   :  { %v2514_v50 = vrot.slane %v2504_v47, 7 }
0x1be0   :  { %v2529_v51 = vsel %vm2528_vm10, %v2522_v40, -inf  ;;  %v2525_v52 = vsel %vm2524_vm11, %v2504_v47, %v2522_v40  ;;  %v2552_v61 = vmul.f32 %v2550_v58, %v2522_v40 }
0x1be1   :  { %v2520_v16 = vsel %vm2519_vm12, %v2514_v50, %v2517_v44  ;;  %2530 = vmax.xlane.f32.xlu0 %v2529_v51  ;;  %2526 = vmax.xlane.f32.xlu1 %v2525_v52  ;;  %v2551_v63 = vmul.f32 %v2549_v60, %v2525_v52 }
0x1be2   :  { %2521 = vst [vmem:[%s3860_s19] sm:$0x3] %v2520_v16  ;;  %v2555_v2 = vsel %vm2528_vm10, %v2552_v61, 0.0 }
0x1c6e   :  { %v2531_v17 = vpop.xlane.xlu0 %2530  ;;  %v2527_v56 = vpop.xlane.xlu1 %2526 }
0x1c6f   :  { %v2533_v45 = vsub.f32 %v2522_v40, %v2531_v17  ;;  %v2532_v46 = vsub.f32 %v2525_v52, %v2527_v56 }
0x1c71   :  { %v2536_v53 = vmul.f32 1.442695, %v2533_v45  ;;  %v2534_v41 = vmul.f32 1.442695, %v2532_v46 }
0x1c73   :  { %3189 = vpow2.f32 %v2536_v53 }
0x1c74   :  { %3191 = vpow2.f32 %v2534_v41 }
0x1c7d   :  { %v3190_v54 = vpop.eup %3189 }
0x1c7e   :  { %v3192_v55 = vpop.eup %3191  ;;  %v2540_v57 = vsel %vm2528_vm10, %v3190_v54, 0.0 }
0x1c7f   :  { %2538 = vadd.xlane.f32.xlu1 %v3192_v55  ;;  %2541 = vadd.xlane.f32.xlu0 %v2540_v57 }
0x1c83   :  { %2558 = vadd.xlane.f32.xlu1 %v2549_v60  ;;  %2561 = vadd.xlane.f32.xlu0 %v2560_v59 }
0x1c87   :  { %2553 = vadd.xlane.f32.xlu1 %v2551_v63  ;;  %2556 = vadd.xlane.f32.xlu0 %v2555_v2 }
0x1d0c   :  { %v2539_v3 = vpop.xlane.xlu1 %2538  ;;  %v2542_v4 = vpop.xlane.xlu0 %2541 }
0x1d0d   :  { %3193 = vlog2.f32 %v2539_v3 }
0x1d0e   :  { %3195 = vlog2.f32 %v2542_v4 }
0x1d10   :  { %v2562_v5 = vpop.xlane.xlu0 %2561  ;;  %v2559_v6 = vpop.xlane.xlu1 %2558 }
0x1d11   :  { %v2575_v7 = vsel %vm2528_vm10, %v2562_v5, 0.0 }
0x1d12   :  { %v2576_v8 = vadd.f32 %v2575_v7, %v2559_v6 }
0x1d14   :  { %v2577_v9 = vrot.slane %v2576_v8, 4  ;;  %v2554_v19 = vpop.xlane.xlu1 %2553  ;;  %v2557_v21 = vpop.xlane.xlu0 %2556 }
0x1d16   :  { %v2578_v10 = vadd.f32 %v2577_v9, %v2576_v8 }
0x1d17   :  { %v3194_v11 = vpop.eup %3193 }
0x1d18   :  { %v3196_v12 = vpop.eup %3195  ;;  %v2544_v13 = vmul.f32 0.6931472, %v3194_v11  ;;  %v2579_v14 = vrot.slane %v2578_v10, 2 }
0x1d19   :  { %v2546_v62 = vmul.f32 0.6931472, %v3196_v12 }
0x1d1a   :  { %v2580_v15 = vadd.f32 %v2579_v14, %v2578_v10  ;;  %v2547_v18 = vadd.f32 %v2544_v13, %v2527_v56 }
0x1d1b   :  { %v2548_v20 = vadd.f32 %v2546_v62, %v2531_v17 }
0x1d1c   :  { %v2581_v48 = vrot.slane %v2580_v15, 1  ;;  %v2563_v49 = vsub.f32 %v2547_v18, %v2554_v19 }
0x1d1d   :  { %v2564_v23 = vsub.f32 %v2548_v20, %v2557_v21 }
0x1d1e   :  { %v2582_v1 = vadd.f32 %v2581_v48, %v2580_v15  ;;  %v2565_v24 = vmul.f32 %v2563_v49, %v2559_v6 }
0x1d1f   :  { %v2566_v0 = vmul.f32 %v2564_v23, %v2562_v5 }
0x1d20   :  { %v2583_v25 = vmax.f32 %v2582_v1, 1.0 }
0x1d21   :  { %v2567_v26 = vsel %vm2528_vm10, %v2566_v0, 0.0 }
0x1d22   :  { %v2568_v27 = vadd.f32 %v2567_v26, %v2565_v24  ;;  %3197 = vrcp.f32 %v2583_v25 }
0x1d24   :  { %v2569_v28 = vrot.slane %v2568_v27, 4 }
0x1d26   :  { %v2570_v22 = vadd.f32 %v2569_v28, %v2568_v27 }
0x1d28   :  { %v2571_v29 = vrot.slane %v2570_v22, 2 }
0x1d2a   :  { %v2572_v30 = vadd.f32 %v2571_v29, %v2570_v22 }
0x1d2c   :  { %v2573_v31 = vrot.slane %v2572_v30, 1  ;;  %v3198_v32 = vpop.eup %3197 }
0x1d2e   :  { %v2574_v36 = vadd.f32 %v2573_v31, %v2572_v30 }
0x1d30   :  { %v2585_v33 = vmul.f32 %v3198_v32, %v2574_v36 }
0x1d32   :  { %2587 = vst.msk [vmem:[#allocation2] sm:$0x1] %vm2586_vm13, %v2585_v33 }
0x1d33   :  { %3210 = shalt.err (!%p3207_p4)
}
0x1d34   :  { %s3211_s10 = scalar_lea.hbm %s3859_s18, 16 }
0x1d35   :  { %p3212_p5 = scmp.ne.s32.totalorder %s3859_s18, %s3211_s10  ;;  %p3215_p6 = scmp.lt.u32.totalorder %s3211_s10, %s3859_s18 }
0x1d37   :  { %p3217_p7 = pnand %p3215_p6, %p3212_p5 }
0x1d39   :  { %3220 = shalt.err (!%p3217_p7)
}
0x1d3a   :  { %2597 = dma.vmem_to_hbm [thread:$0]  %s2595_s24, 16, %s3859_s18, [#allocation3]  }
0x1d3b   :  { %3221 = dma.done.wait [#allocation3], 16  }
0x1d3c   :  { %3222 = vsyncadd [#allocation3], 4294967280 }
0x1d3d   :  { %2605 = vsyncpa [#allocation3], 1 }

</bundles_post_ra>
